<compile_context>
chip_gen: v6e
topology: v6e:2x2x1
jax: 0.10.0
libtpu: 0.0.40
codegen_flags: <defaults>
</compile_context>

<pallas_src>
import math

import jax
import jax.numpy as jnp
from jax.experimental import pallas as pl
from jax.experimental.pallas import tpu as pltpu

# ---------------- Synthetic (scaled-down) BERT config ----------------
BATCH = 2
SEQ = 8
HIDDEN = 128          # lane-friendly stand-in for 768
NUM_LAYERS = 2
NUM_HEADS = 2
HEAD_DIM = HIDDEN // NUM_HEADS
INTER = 4 * HIDDEN
VOCAB = 1000
MAX_POS = 64
TYPE_VOCAB = 2
LN_EPS = 1e-12
BS = BATCH * SEQ      # all rows packed into one tile -> weights read once/layer
SCALE = 1.0 / math.sqrt(HEAD_DIM)
_INV_SQRT2 = 0.7071067811865475


# ---------------- in-kernel math helpers ----------------
def _layer_norm(x, gamma, beta):
    mu = jnp.mean(x, axis=-1, keepdims=True)
    var = jnp.mean((x - mu) ** 2, axis=-1, keepdims=True)
    return (x - mu) * jax.lax.rsqrt(var + LN_EPS) * gamma + beta


def _gelu_exact(x):
    # HF BertModel default is exact erf-GELU; erf lowers to the EUP.
    return 0.5 * x * (1.0 + jax.lax.erf(x * _INV_SQRT2))


# ---------------- fused BERT encoder kernel ----------------
def bert_encoder_kernel(
    x_ref,                        # (BS, H) summed embeddings (all sequences)
    eg_ref, eb_ref,               # embedding LayerNorm gamma/beta (1, H)
    wqkv_ref, bqkv_ref,           # (H, 3H) bf16, (1, 3H) f32        [per layer]
    wo_ref, bo_ref,               # (H, H)  bf16, (1, H)             [per layer]
    g1_ref, b1_ref,               # post-attention LayerNorm (1, H)  [per layer]
    wi_ref, bi_ref,               # FFN in  (H, I) bf16, (1, I)      [per layer]
    wo2_ref, bo2_ref,             # FFN out (I, H) bf16, (1, H)      [per layer]
    g2_ref, b2_ref,               # post-FFN LayerNorm (1, H)        [per layer]
    hid_ref,                      # out: last_hidden (BS, H), resident across layers
):
    layer = pl.program_id(0)

    # Embedding LayerNorm (dropout is identity in eval mode); runs once,
    # seeding the resident hidden-state block.
    @pl.when(layer == 0)
    def _():
        hid_ref[...] = _layer_norm(x_ref[...], eg_ref[...], eb_ref[...])

    h = hid_ref[...]                       # f32 activations, (BS, H)
    h16 = h.astype(jnp.bfloat16)           # bf16 operands for the MXU

    # ---- fused QKV projection: one (BS,H)x(H,3H) matmul ----
    qkv = jnp.dot(h16, wqkv_ref[...],
                  preferred_element_type=jnp.float32) + bqkv_ref[...]
    q = qkv[:, :HIDDEN] * SCALE            # fold 1/sqrt(d) into q (f32, H lanes)
    k = qkv[:, HIDDEN:2 * HIDDEN]
    v = qkv[:, 2 * HIDDEN:]

    # ---- multi-head self-attention, batched over (batch * heads) ----
    def split_heads(t):  # (BS, H) -> (BATCH*NUM_HEADS, SEQ, HEAD_DIM)
        t = t.reshape(BATCH, SEQ, NUM_HEADS, HEAD_DIM)
        t = jnp.transpose(t, (0, 2, 1, 3))
        return t.reshape(BATCH * NUM_HEADS, SEQ, HEAD_DIM)

    qh, kh, vh = split_heads(q), split_heads(k), split_heads(v)
    s = jnp.einsum("bqd,bkd->bqk", qh, kh,
                   preferred_element_type=jnp.float32)
    s = s - jnp.max(s, axis=-1, keepdims=True)
    p = jnp.exp(s)
    p = p * pl.reciprocal(jnp.sum(p, axis=-1, keepdims=True), approx=True)
    ctx = jnp.einsum("bqk,bkd->bqd", p, vh,
                     preferred_element_type=jnp.float32)
    # merge heads back to (BS, H)
    ctx = jnp.transpose(ctx.reshape(BATCH, NUM_HEADS, SEQ, HEAD_DIM),
                        (0, 2, 1, 3)).reshape(BS, HIDDEN)

    attn = jnp.dot(ctx.astype(jnp.bfloat16), wo_ref[...],
                   preferred_element_type=jnp.float32) + bo_ref[...]
    h = _layer_norm(attn + h, g1_ref[...], b1_ref[...])

    # ---- feed-forward (exact erf-GELU) ----
    ff = jnp.dot(h.astype(jnp.bfloat16), wi_ref[...],
                 preferred_element_type=jnp.float32) + bi_ref[...]
    ff = _gelu_exact(ff)
    ff = jnp.dot(ff.astype(jnp.bfloat16), wo2_ref[...],
                 preferred_element_type=jnp.float32) + bo2_ref[...]
    hid_ref[...] = _layer_norm(ff + h, g2_ref[...], b2_ref[...])


# ---------------- wrapper ----------------
def clinical_bert_forward(input_ids, p):
    """p must come from prepare_params() (weights pre-fused / pre-cast)."""
    # Embedding gather (pure indexing) kept in JAX glue.
    emb = (p["word_emb"][input_ids]
           + p["pos_emb"][:SEQ][None, :, :]
           + p["type_emb"][0][None, None, :])
    x = emb.reshape(BS, HIDDEN).astype(jnp.float32)

    kernel_inputs = [
        x,
        p["emb_ln_g"], p["emb_ln_b"],
        p["wqkv"], p["bqkv"],
        p["wo"], p["bo"],
        p["ln1_g"], p["ln1_b"],
        p["wi"], p["bi"],
        p["wo2"], p["bo2"],
        p["ln2_g"], p["ln2_b"],
    ]

    def shared(shape):  # constant block index -> loaded once, stays resident
        nd = len(shape)
        return pl.BlockSpec(shape, lambda l, _n=nd: (0,) * _n)

    def per_layer(shape):  # `shape` excludes the leading layer dim
        nd = len(shape)
        return pl.BlockSpec((None,) + shape,
                            lambda l, _n=nd: (l,) + (0,) * _n)

    in_specs = [
        shared((BS, HIDDEN)),                                          # x
        shared((1, HIDDEN)), shared((1, HIDDEN)),                      # emb LN
        per_layer((HIDDEN, 3 * HIDDEN)), per_layer((1, 3 * HIDDEN)),   # wqkv, bqkv
        per_layer((HIDDEN, HIDDEN)), per_layer((1, HIDDEN)),           # wo, bo
        per_layer((1, HIDDEN)), per_layer((1, HIDDEN)),                # ln1
        per_layer((HIDDEN, INTER)), per_layer((1, INTER)),             # wi, bi
        per_layer((INTER, HIDDEN)), per_layer((1, HIDDEN)),            # wo2, bo2
        per_layer((1, HIDDEN)), per_layer((1, HIDDEN)),                # ln2
    ]
    out_shape = jax.ShapeDtypeStruct((BS, HIDDEN), jnp.float32)        # last_hidden
    out_specs = pl.BlockSpec((BS, HIDDEN), lambda l: (0, 0))           # resident across l

    # Advisory cost hint for the XLA scheduler (weights read once per layer).
    per_layer_flops = 2 * BS * (3 * HIDDEN * HIDDEN + HIDDEN * HIDDEN
                                + 2 * HIDDEN * INTER)
    attn_flops = 2 * BATCH * NUM_HEADS * SEQ * SEQ * 2 * HEAD_DIM
    weight_bytes = NUM_LAYERS * 2 * (3 * HIDDEN * HIDDEN + HIDDEN * HIDDEN
                                     + 2 * HIDDEN * INTER)
    cost = pl.CostEstimate(
        flops=NUM_LAYERS * (per_layer_flops + attn_flops),
        transcendentals=NUM_LAYERS * (BS * INTER
                                      + BATCH * NUM_HEADS * SEQ * SEQ),
        bytes_accessed=weight_bytes + 3 * BS * HIDDEN * 4,
    )

    last_hidden_flat = pl.pallas_call(
        bert_encoder_kernel,
        out_shape=out_shape,
        grid_spec=pltpu.PrefetchScalarGridSpec(
            num_scalar_prefetch=0,
            grid=(NUM_LAYERS,),                 # layers streamed; weights 1x/layer
            in_specs=in_specs,
            out_specs=out_specs,
        ),
        compiler_params=pltpu.CompilerParams(
            dimension_semantics=("arbitrary",),
            vmem_limit_bytes=48 * 1024 * 1024,  # explicit budget (v7x-safe)
        ),
        cost_estimate=cost,
    )(*kernel_inputs)

    last_hidden_state = last_hidden_flat.reshape(BATCH, SEQ, HIDDEN)

    # ---- pooler hoisted out of the kernel: tanh(W @ h[CLS] + b), tiny XLA op ----
    cls = last_hidden_state[:, 0, :]                       # (BATCH, H)
    pooler_output = jnp.tanh(cls @ p["wp"] + p["bp"])      # (BATCH, H)
    return last_hidden_state, pooler_output


# ---------------- one-time parameter preparation ----------------
def prepare_params(params):
    """Fuse Q|K|V and cast weight matrices to bf16 ONCE (outside the hot path)."""
    wdt = jnp.bfloat16
    out = dict(params)
    out["wqkv"] = jnp.concatenate(
        [params["wq"], params["wk"], params["wv"]], axis=-1).astype(wdt)  # (L,H,3H)
    out["bqkv"] = jnp.concatenate(
        [params["bq"], params["bk"], params["bv"]], axis=-1)              # (L,1,3H)
    out["wo"] = params["wo"].astype(wdt)
    out["wi"] = params["wi"].astype(wdt)
    out["wo2"] = params["wo2"].astype(wdt)
    for k in ("wq", "wk", "wv", "bq", "bk", "bv"):
        del out[k]
    return out


# ---------------- deterministic parameter init (BERT-style) ----------------
def init_params(key):
    ks = jax.random.split(key, 10)
    std = 0.02

    def nrm(k, shape):
        return (std * jax.random.normal(k, shape)).astype(jnp.float32)

    L, H, I = NUM_LAYERS, HIDDEN, INTER
    return {
        "word_emb": nrm(ks[0], (VOCAB, H)),
        "pos_emb": nrm(ks[1], (MAX_POS, H)),
        "type_emb": nrm(ks[2], (TYPE_VOCAB, H)),
        "emb_ln_g": jnp.ones((1, H), jnp.float32),
        "emb_ln_b": jnp.zeros((1, H), jnp.float32),
        "wq": nrm(ks[3], (L, H, H)),
        "wk": nrm(ks[4], (L, H, H)),
        "wv": nrm(ks[5], (L, H, H)),
        "wo": nrm(ks[6], (L, H, H)),
        "bq": jnp.zeros((L, 1, H), jnp.float32),
        "bk": jnp.zeros((L, 1, H), jnp.float32),
        "bv": jnp.zeros((L, 1, H), jnp.float32),
        "bo": jnp.zeros((L, 1, H), jnp.float32),
        "ln1_g": jnp.ones((L, 1, H), jnp.float32),
        "ln1_b": jnp.zeros((L, 1, H), jnp.float32),
        "wi": nrm(ks[7], (L, H, I)),
        "bi": jnp.zeros((L, 1, I), jnp.float32),
        "wo2": nrm(ks[8], (L, I, H)),
        "bo2": jnp.zeros((L, 1, H), jnp.float32),
        "ln2_g": jnp.ones((L, 1, H), jnp.float32),
        "ln2_b": jnp.zeros((L, 1, H), jnp.float32),
        "wp": nrm(ks[9], (H, H)),
        "bp": jnp.zeros((1, H), jnp.float32),
    }


if __name__ == "__main__":
    key = jax.random.PRNGKey(0)
    pkey, ikey = jax.random.split(key)
    params = prepare_params(init_params(pkey))   # fuse/cast once, off the hot path
    input_ids = jax.random.randint(ikey, (BATCH, SEQ), 0, VOCAB, dtype=jnp.int32)

    fwd = jax.jit(clinical_bert_forward)
    last_hidden, pooled = fwd(input_ids, params)
    last_hidden = jax.block_until_ready(last_hidden)
    pooled = jax.block_until_ready(pooled)

    assert last_hidden.shape == (BATCH, SEQ, HIDDEN)
    assert pooled.shape == (BATCH, HIDDEN)
    assert bool(jnp.isfinite(last_hidden).all()) and bool(jnp.isfinite(pooled).all())
    print("KERNEL_OK")
</pallas_src>

<mosaic_0001>
module attributes {stable_mosaic.version = 11 : i64} {
  func.func @bert_encoder_kernel(%arg0: i32, %arg1: memref<16x128xf32, #tpu.memory_space<vmem>>, %arg2: memref<1x128xf32, #tpu.memory_space<vmem>>, %arg3: memref<1x128xf32, #tpu.memory_space<vmem>>, %arg4: memref<1x128x384xbf16, #tpu.memory_space<vmem>>, %arg5: memref<1x1x384xf32, #tpu.memory_space<vmem>>, %arg6: memref<1x128x128xbf16, #tpu.memory_space<vmem>>, %arg7: memref<1x1x128xf32, #tpu.memory_space<vmem>>, %arg8: memref<1x1x128xf32, #tpu.memory_space<vmem>>, %arg9: memref<1x1x128xf32, #tpu.memory_space<vmem>>, %arg10: memref<1x128x512xbf16, #tpu.memory_space<vmem>>, %arg11: memref<1x1x512xf32, #tpu.memory_space<vmem>>, %arg12: memref<1x512x128xbf16, #tpu.memory_space<vmem>>, %arg13: memref<1x1x128xf32, #tpu.memory_space<vmem>>, %arg14: memref<1x1x128xf32, #tpu.memory_space<vmem>>, %arg15: memref<1x1x128xf32, #tpu.memory_space<vmem>>, %arg16: memref<16x128xf32, #tpu.memory_space<vmem>>) attributes {dimension_semantics = [#tpu.dimension_semantics<arbitrary>], iteration_bounds = array<i64: 2>, scalar_prefetch = 0 : i64, scratch_operands = 0 : i64, tpu.core_type = #tpu.core_type<tc>, window_params = [{pipeline_mode = #tpu.pipeline_mode<synchronous>, transform_indices = @transform_0, window_bounds = array<i64: 16, 128>}, {pipeline_mode = #tpu.pipeline_mode<synchronous>, transform_indices = @transform_1, window_bounds = array<i64: 1, 128>}, {pipeline_mode = #tpu.pipeline_mode<synchronous>, transform_indices = @transform_2, window_bounds = array<i64: 1, 128>}, {transform_indices = @transform_3, window_bounds = array<i64: 1, 128, 384>}, {transform_indices = @transform_4, window_bounds = array<i64: 1, 1, 384>}, {transform_indices = @transform_5, window_bounds = array<i64: 1, 128, 128>}, {transform_indices = @transform_6, window_bounds = array<i64: 1, 1, 128>}, {transform_indices = @transform_7, window_bounds = array<i64: 1, 1, 128>}, {transform_indices = @transform_8, window_bounds = array<i64: 1, 1, 128>}, {transform_indices = @transform_9, window_bounds = array<i64: 1, 128, 512>}, {transform_indices = @transform_10, window_bounds = array<i64: 1, 1, 512>}, {transform_indices = @transform_11, window_bounds = array<i64: 1, 512, 128>}, {transform_indices = @transform_12, window_bounds = array<i64: 1, 1, 128>}, {transform_indices = @transform_13, window_bounds = array<i64: 1, 1, 128>}, {transform_indices = @transform_14, window_bounds = array<i64: 1, 1, 128>}, {pipeline_mode = #tpu.pipeline_mode<synchronous>, transform_indices = @transform_15, window_bounds = array<i64: 16, 128>}]} {
    %c0_i32 = arith.constant 0 : i32
    %0 = arith.cmpi eq, %arg0, %c0_i32 : i32
    %1 = arith.extui %0 : i1 to i32
    %c0_i32_0 = arith.constant 0 : i32
    %2 = arith.cmpi ne, %1, %c0_i32_0 : i32
    scf.if %2 {
      %c0_61 = arith.constant 0 : index
      %c0_62 = arith.constant 0 : index
      %128 = vector.load %arg1[%c0_61, %c0_62] : memref<16x128xf32, #tpu.memory_space<vmem>>, vector<16x128xf32>
      %c0_63 = arith.constant 0 : index
      %c0_64 = arith.constant 0 : index
      %129 = vector.load %arg2[%c0_63, %c0_64] : memref<1x128xf32, #tpu.memory_space<vmem>>, vector<1x128xf32>
      %c0_65 = arith.constant 0 : index
      %c0_66 = arith.constant 0 : index
      %130 = vector.load %arg3[%c0_65, %c0_66] : memref<1x128xf32, #tpu.memory_space<vmem>>, vector<1x128xf32>
      %cst_67 = arith.constant dense<0.000000e+00> : vector<16xf32>
      %131 = vector.multi_reduction <add>, %128, %cst_67 [1] : vector<16x128xf32> to vector<16xf32>
      %132 = vector.shape_cast %131 : vector<16xf32> to vector<16x1xf32>
      %cst_68 = arith.constant 1.280000e+02 : f32
      %133 = vector.broadcast %cst_68 : f32 to vector<16x1xf32>
      %134 = arith.divf %132, %133 : vector<16x1xf32>
      %135 = vector.broadcast %134 : vector<16x1xf32> to vector<16x128xf32>
      %136 = arith.subf %128, %135 : vector<16x128xf32>
      %137 = arith.mulf %136, %136 : vector<16x128xf32>
      %cst_69 = arith.constant dense<0.000000e+00> : vector<16xf32>
      %138 = vector.multi_reduction <add>, %137, %cst_69 [1] : vector<16x128xf32> to vector<16xf32>
      %139 = vector.shape_cast %138 : vector<16xf32> to vector<16x1xf32>
      %cst_70 = arith.constant 1.280000e+02 : f32
      %140 = vector.broadcast %cst_70 : f32 to vector<16x1xf32>
      %141 = arith.divf %139, %140 : vector<16x1xf32>
      %142 = vector.broadcast %134 : vector<16x1xf32> to vector<16x128xf32>
      %143 = arith.subf %128, %142 : vector<16x128xf32>
      %cst_71 = arith.constant 9.99999996E-13 : f32
      %144 = vector.broadcast %cst_71 : f32 to vector<16x1xf32>
      %145 = arith.addf %141, %144 : vector<16x1xf32>
      %146 = math.rsqrt %145 : vector<16x1xf32>
      %147 = vector.broadcast %146 : vector<16x1xf32> to vector<16x128xf32>
      %148 = arith.mulf %143, %147 : vector<16x128xf32>
      %149 = vector.broadcast %129 : vector<1x128xf32> to vector<16x128xf32>
      %150 = arith.mulf %148, %149 : vector<16x128xf32>
      %151 = vector.broadcast %130 : vector<1x128xf32> to vector<16x128xf32>
      %152 = arith.addf %150, %151 : vector<16x128xf32>
      %c0_72 = arith.constant 0 : index
      %c0_73 = arith.constant 0 : index
      %153 = vector.load %arg16[%c0_72, %c0_73] : memref<16x128xf32, #tpu.memory_space<vmem>>, vector<16x128xf32>
      tpu.vector_store %arg16[%c0_72, %c0_73], %152 {strides = array<i32>} : memref<16x128xf32, #tpu.memory_space<vmem>>, vector<16x128xf32>,
    } else {
    }
    %c0 = arith.constant 0 : index
    %c0_1 = arith.constant 0 : index
    %3 = vector.load %arg16[%c0, %c0_1] : memref<16x128xf32, #tpu.memory_space<vmem>>, vector<16x128xf32>
    %4 = arith.truncf %3 : vector<16x128xf32> to vector<16x128xbf16>
    %c0_2 = arith.constant 0 : index
    %c0_3 = arith.constant 0 : index
    %c0_4 = arith.constant 0 : index
    %5 = vector.load %arg4[%c0_2, %c0_3, %c0_4] : memref<1x128x384xbf16, #tpu.memory_space<vmem>>, vector<1x128x384xbf16>
    %6 = vector.shape_cast %5 : vector<1x128x384xbf16> to vector<128x384xbf16>
    %cst = arith.constant dense<0.000000e+00> : vector<16x384xf32>
    %7 = tpu.matmul %4, %6, %cst {dimension_numbers = #tpu.dot_dimension_numbers<[1], [0], [0], [1], [0, 0, 1, 1], [], []>} : vector<16x128xbf16>, vector<128x384xbf16>, vector<16x384xf32> -> vector<16x384xf32>
    %c0_5 = arith.constant 0 : index
    %c0_6 = arith.constant 0 : index
    %c0_7 = arith.constant 0 : index
    %8 = vector.load %arg5[%c0_5, %c0_6, %c0_7] : memref<1x1x384xf32, #tpu.memory_space<vmem>>, vector<1x1x384xf32>
    %9 = vector.shape_cast %8 : vector<1x1x384xf32> to vector<1x384xf32>
    %10 = vector.broadcast %9 : vector<1x384xf32> to vector<16x384xf32>
    %11 = arith.addf %7, %10 : vector<16x384xf32>
    %12 = vector.extract_strided_slice %11 {offsets = [0, 0], sizes = [16, 128], strides = [1, 1]} : vector<16x384xf32> to vector<16x128xf32>
    %cst_8 = arith.constant 1.250000e-01 : f32
    %13 = vector.broadcast %cst_8 : f32 to vector<16x128xf32>
    %14 = arith.mulf %12, %13 : vector<16x128xf32>
    %15 = vector.extract_strided_slice %11 {offsets = [0, 128], sizes = [16, 128], strides = [1, 1]} : vector<16x384xf32> to vector<16x128xf32>
    %16 = vector.extract_strided_slice %11 {offsets = [0, 256], sizes = [16, 128], strides = [1, 1]} : vector<16x384xf32> to vector<16x128xf32>
    %17 = vector.shape_cast %14 : vector<16x128xf32> to vector<2x8x2x64xf32>
    %18 = tpu.transpose %17, [0, 2, 1, 3] : vector<2x8x2x64xf32> -> vector<2x2x8x64xf32>
    %19 = vector.shape_cast %18 : vector<2x2x8x64xf32> to vector<4x8x64xf32>
    %20 = vector.shape_cast %15 : vector<16x128xf32> to vector<2x8x2x64xf32>
    %21 = tpu.transpose %20, [0, 2, 1, 3] : vector<2x8x2x64xf32> -> vector<2x2x8x64xf32>
    %22 = vector.shape_cast %21 : vector<2x2x8x64xf32> to vector<4x8x64xf32>
    %23 = vector.shape_cast %16 : vector<16x128xf32> to vector<2x8x2x64xf32>
    %24 = tpu.transpose %23, [0, 2, 1, 3] : vector<2x8x2x64xf32> -> vector<2x2x8x64xf32>
    %25 = vector.shape_cast %24 : vector<2x2x8x64xf32> to vector<4x8x64xf32>
    "tpu.trace_start"() <{level = 10 : i32, message = "bqd,bkd->bqk"}> : () -> ()
    %cst_9 = arith.constant dense<0.000000e+00> : vector<4x8x8xf32>
    %26 = tpu.matmul %19, %22, %cst_9 {dimension_numbers = #tpu.dot_dimension_numbers<[2], [2], [1], [1], [0, 0, 0, 1, 1, 1], [0], [0]>} : vector<4x8x64xf32>, vector<4x8x64xf32>, vector<4x8x8xf32> -> vector<4x8x8xf32>
    "tpu.trace_stop"() : () -> ()
    %cst_10 = arith.constant dense<0xFF800000> : vector<4x8xf32>
    %27 = vector.multi_reduction <maximumf>, %26, %cst_10 [2] : vector<4x8x8xf32> to vector<4x8xf32>
    %28 = vector.shape_cast %27 : vector<4x8xf32> to vector<4x8x1xf32>
    %29 = vector.broadcast %28 : vector<4x8x1xf32> to vector<4x8x8xf32>
    %30 = arith.subf %26, %29 : vector<4x8x8xf32>
    %31 = math.exp %30 : vector<4x8x8xf32>
    %cst_11 = arith.constant dense<0.000000e+00> : vector<4x8xf32>
    %32 = vector.multi_reduction <add>, %31, %cst_11 [2] : vector<4x8x8xf32> to vector<4x8xf32>
    %33 = vector.shape_cast %32 : vector<4x8xf32> to vector<4x8x1xf32>
    %34 = tpu.reciprocal %33 {approx = true} : vector<4x8x1xf32> -> vector<4x8x1xf32>
    %35 = vector.broadcast %34 : vector<4x8x1xf32> to vector<4x8x8xf32>
    %36 = arith.mulf %31, %35 : vector<4x8x8xf32>
    "tpu.trace_start"() <{level = 10 : i32, message = "bqk,bkd->bqd"}> : () -> ()
    %cst_12 = arith.constant dense<0.000000e+00> : vector<4x8x64xf32>
    %37 = tpu.matmul %36, %25, %cst_12 {dimension_numbers = #tpu.dot_dimension_numbers<[2], [1], [1], [2], [0, 0, 0, 1, 1, 2], [0], [0]>} : vector<4x8x8xf32>, vector<4x8x64xf32>, vector<4x8x64xf32> -> vector<4x8x64xf32>
    "tpu.trace_stop"() : () -> ()
    %38 = vector.shape_cast %37 : vector<4x8x64xf32> to vector<2x2x8x64xf32>
    %39 = tpu.transpose %38, [0, 2, 1, 3] : vector<2x2x8x64xf32> -> vector<2x8x2x64xf32>
    %40 = vector.shape_cast %39 : vector<2x8x2x64xf32> to vector<16x128xf32>
    %41 = arith.truncf %40 : vector<16x128xf32> to vector<16x128xbf16>
    %c0_13 = arith.constant 0 : index
    %c0_14 = arith.constant 0 : index
    %c0_15 = arith.constant 0 : index
    %42 = vector.load %arg6[%c0_13, %c0_14, %c0_15] : memref<1x128x128xbf16, #tpu.memory_space<vmem>>, vector<1x128x128xbf16>
    %43 = vector.shape_cast %42 : vector<1x128x128xbf16> to vector<128x128xbf16>
    %cst_16 = arith.constant dense<0.000000e+00> : vector<16x128xf32>
    %44 = tpu.matmul %41, %43, %cst_16 {dimension_numbers = #tpu.dot_dimension_numbers<[1], [0], [0], [1], [0, 0, 1, 1], [], []>} : vector<16x128xbf16>, vector<128x128xbf16>, vector<16x128xf32> -> vector<16x128xf32>
    %c0_17 = arith.constant 0 : index
    %c0_18 = arith.constant 0 : index
    %c0_19 = arith.constant 0 : index
    %45 = vector.load %arg7[%c0_17, %c0_18, %c0_19] : memref<1x1x128xf32, #tpu.memory_space<vmem>>, vector<1x1x128xf32>
    %46 = vector.shape_cast %45 : vector<1x1x128xf32> to vector<1x128xf32>
    %47 = vector.broadcast %46 : vector<1x128xf32> to vector<16x128xf32>
    %48 = arith.addf %44, %47 : vector<16x128xf32>
    %49 = arith.addf %48, %3 : vector<16x128xf32>
    %c0_20 = arith.constant 0 : index
    %c0_21 = arith.constant 0 : index
    %c0_22 = arith.constant 0 : index
    %50 = vector.load %arg8[%c0_20, %c0_21, %c0_22] : memref<1x1x128xf32, #tpu.memory_space<vmem>>, vector<1x1x128xf32>
    %51 = vector.shape_cast %50 : vector<1x1x128xf32> to vector<1x128xf32>
    %c0_23 = arith.constant 0 : index
    %c0_24 = arith.constant 0 : index
    %c0_25 = arith.constant 0 : index
    %52 = vector.load %arg9[%c0_23, %c0_24, %c0_25] : memref<1x1x128xf32, #tpu.memory_space<vmem>>, vector<1x1x128xf32>
    %53 = vector.shape_cast %52 : vector<1x1x128xf32> to vector<1x128xf32>
    %cst_26 = arith.constant dense<0.000000e+00> : vector<16xf32>
    %54 = vector.multi_reduction <add>, %49, %cst_26 [1] : vector<16x128xf32> to vector<16xf32>
    %55 = vector.shape_cast %54 : vector<16xf32> to vector<16x1xf32>
    %cst_27 = arith.constant 1.280000e+02 : f32
    %56 = vector.broadcast %cst_27 : f32 to vector<16x1xf32>
    %57 = arith.divf %55, %56 : vector<16x1xf32>
    %58 = vector.broadcast %57 : vector<16x1xf32> to vector<16x128xf32>
    %59 = arith.subf %49, %58 : vector<16x128xf32>
    %60 = arith.mulf %59, %59 : vector<16x128xf32>
    %cst_28 = arith.constant dense<0.000000e+00> : vector<16xf32>
    %61 = vector.multi_reduction <add>, %60, %cst_28 [1] : vector<16x128xf32> to vector<16xf32>
    %62 = vector.shape_cast %61 : vector<16xf32> to vector<16x1xf32>
    %cst_29 = arith.constant 1.280000e+02 : f32
    %63 = vector.broadcast %cst_29 : f32 to vector<16x1xf32>
    %64 = arith.divf %62, %63 : vector<16x1xf32>
    %65 = vector.broadcast %57 : vector<16x1xf32> to vector<16x128xf32>
    %66 = arith.subf %49, %65 : vector<16x128xf32>
    %cst_30 = arith.constant 9.99999996E-13 : f32
    %67 = vector.broadcast %cst_30 : f32 to vector<16x1xf32>
    %68 = arith.addf %64, %67 : vector<16x1xf32>
    %69 = math.rsqrt %68 : vector<16x1xf32>
    %70 = vector.broadcast %69 : vector<16x1xf32> to vector<16x128xf32>
    %71 = arith.mulf %66, %70 : vector<16x128xf32>
    %72 = vector.broadcast %51 : vector<1x128xf32> to vector<16x128xf32>
    %73 = arith.mulf %71, %72 : vector<16x128xf32>
    %74 = vector.broadcast %53 : vector<1x128xf32> to vector<16x128xf32>
    %75 = arith.addf %73, %74 : vector<16x128xf32>
    %76 = arith.truncf %75 : vector<16x128xf32> to vector<16x128xbf16>
    %c0_31 = arith.constant 0 : index
    %c0_32 = arith.constant 0 : index
    %c0_33 = arith.constant 0 : index
    %77 = vector.load %arg10[%c0_31, %c0_32, %c0_33] : memref<1x128x512xbf16, #tpu.memory_space<vmem>>, vector<1x128x512xbf16>
    %78 = vector.shape_cast %77 : vector<1x128x512xbf16> to vector<128x512xbf16>
    %cst_34 = arith.constant dense<0.000000e+00> : vector<16x512xf32>
    %79 = tpu.matmul %76, %78, %cst_34 {dimension_numbers = #tpu.dot_dimension_numbers<[1], [0], [0], [1], [0, 0, 1, 1], [], []>} : vector<16x128xbf16>, vector<128x512xbf16>, vector<16x512xf32> -> vector<16x512xf32>
    %c0_35 = arith.constant 0 : index
    %c0_36 = arith.constant 0 : index
    %c0_37 = arith.constant 0 : index
    %80 = vector.load %arg11[%c0_35, %c0_36, %c0_37] : memref<1x1x512xf32, #tpu.memory_space<vmem>>, vector<1x1x512xf32>
    %81 = vector.shape_cast %80 : vector<1x1x512xf32> to vector<1x512xf32>
    %82 = vector.broadcast %81 : vector<1x512xf32> to vector<16x512xf32>
    %83 = arith.addf %79, %82 : vector<16x512xf32>
    %cst_38 = arith.constant 5.000000e-01 : f32
    %84 = vector.broadcast %cst_38 : f32 to vector<16x512xf32>
    %85 = arith.mulf %84, %83 : vector<16x512xf32>
    %cst_39 = arith.constant 0.707106769 : f32
    %86 = vector.broadcast %cst_39 : f32 to vector<16x512xf32>
    %87 = arith.mulf %83, %86 : vector<16x512xf32>
    %88 = math.erf %87 : vector<16x512xf32>
    %cst_40 = arith.constant 1.000000e+00 : f32
    %89 = vector.broadcast %cst_40 : f32 to vector<16x512xf32>
    %90 = arith.addf %89, %88 : vector<16x512xf32>
    %91 = arith.mulf %85, %90 : vector<16x512xf32>
    %92 = arith.truncf %91 : vector<16x512xf32> to vector<16x512xbf16>
    %c0_41 = arith.constant 0 : index
    %c0_42 = arith.constant 0 : index
    %c0_43 = arith.constant 0 : index
    %93 = vector.load %arg12[%c0_41, %c0_42, %c0_43] : memref<1x512x128xbf16, #tpu.memory_space<vmem>>, vector<1x512x128xbf16>
    %94 = vector.shape_cast %93 : vector<1x512x128xbf16> to vector<512x128xbf16>
    %cst_44 = arith.constant dense<0.000000e+00> : vector<16x128xf32>
    %95 = tpu.matmul %92, %94, %cst_44 {dimension_numbers = #tpu.dot_dimension_numbers<[1], [0], [0], [1], [0, 0, 1, 1], [], []>} : vector<16x512xbf16>, vector<512x128xbf16>, vector<16x128xf32> -> vector<16x128xf32>
    %c0_45 = arith.constant 0 : index
    %c0_46 = arith.constant 0 : index
    %c0_47 = arith.constant 0 : index
    %96 = vector.load %arg13[%c0_45, %c0_46, %c0_47] : memref<1x1x128xf32, #tpu.memory_space<vmem>>, vector<1x1x128xf32>
    %97 = vector.shape_cast %96 : vector<1x1x128xf32> to vector<1x128xf32>
    %98 = vector.broadcast %97 : vector<1x128xf32> to vector<16x128xf32>
    %99 = arith.addf %95, %98 : vector<16x128xf32>
    %100 = arith.addf %99, %75 : vector<16x128xf32>
    %c0_48 = arith.constant 0 : index
    %c0_49 = arith.constant 0 : index
    %c0_50 = arith.constant 0 : index
    %101 = vector.load %arg14[%c0_48, %c0_49, %c0_50] : memref<1x1x128xf32, #tpu.memory_space<vmem>>, vector<1x1x128xf32>
    %102 = vector.shape_cast %101 : vector<1x1x128xf32> to vector<1x128xf32>
    %c0_51 = arith.constant 0 : index
    %c0_52 = arith.constant 0 : index
    %c0_53 = arith.constant 0 : index
    %103 = vector.load %arg15[%c0_51, %c0_52, %c0_53] : memref<1x1x128xf32, #tpu.memory_space<vmem>>, vector<1x1x128xf32>
    %104 = vector.shape_cast %103 : vector<1x1x128xf32> to vector<1x128xf32>
    %cst_54 = arith.constant dense<0.000000e+00> : vector<16xf32>
    %105 = vector.multi_reduction <add>, %100, %cst_54 [1] : vector<16x128xf32> to vector<16xf32>
    %106 = vector.shape_cast %105 : vector<16xf32> to vector<16x1xf32>
    %cst_55 = arith.constant 1.280000e+02 : f32
    %107 = vector.broadcast %cst_55 : f32 to vector<16x1xf32>
    %108 = arith.divf %106, %107 : vector<16x1xf32>
    %109 = vector.broadcast %108 : vector<16x1xf32> to vector<16x128xf32>
    %110 = arith.subf %100, %109 : vector<16x128xf32>
    %111 = arith.mulf %110, %110 : vector<16x128xf32>
    %cst_56 = arith.constant dense<0.000000e+00> : vector<16xf32>
    %112 = vector.multi_reduction <add>, %111, %cst_56 [1] : vector<16x128xf32> to vector<16xf32>
    %113 = vector.shape_cast %112 : vector<16xf32> to vector<16x1xf32>
    %cst_57 = arith.constant 1.280000e+02 : f32
    %114 = vector.broadcast %cst_57 : f32 to vector<16x1xf32>
    %115 = arith.divf %113, %114 : vector<16x1xf32>
    %116 = vector.broadcast %108 : vector<16x1xf32> to vector<16x128xf32>
    %117 = arith.subf %100, %116 : vector<16x128xf32>
    %cst_58 = arith.constant 9.99999996E-13 : f32
    %118 = vector.broadcast %cst_58 : f32 to vector<16x1xf32>
    %119 = arith.addf %115, %118 : vector<16x1xf32>
    %120 = math.rsqrt %119 : vector<16x1xf32>
    %121 = vector.broadcast %120 : vector<16x1xf32> to vector<16x128xf32>
    %122 = arith.mulf %117, %121 : vector<16x128xf32>
    %123 = vector.broadcast %102 : vector<1x128xf32> to vector<16x128xf32>
    %124 = arith.mulf %122, %123 : vector<16x128xf32>
    %125 = vector.broadcast %104 : vector<1x128xf32> to vector<16x128xf32>
    %126 = arith.addf %124, %125 : vector<16x128xf32>
    %c0_59 = arith.constant 0 : index
    %c0_60 = arith.constant 0 : index
    %127 = vector.load %arg16[%c0_59, %c0_60] : memref<16x128xf32, #tpu.memory_space<vmem>>, vector<16x128xf32>
    tpu.vector_store %arg16[%c0_59, %c0_60], %126 {strides = array<i32>} : memref<16x128xf32, #tpu.memory_space<vmem>>, vector<16x128xf32>,
    return
  }
  func.func @transform_0(%arg0: i32) -> (i32, i32) {
    %c0_i32 = arith.constant 0 : i32
    %c0_i32_0 = arith.constant 0 : i32
    %c0_i32_1 = arith.constant 0 : i32
    return %c0_i32, %c0_i32_0 : i32, i32
  }
  func.func @transform_1(%arg0: i32) -> (i32, i32) {
    %c0_i32 = arith.constant 0 : i32
    %c0_i32_0 = arith.constant 0 : i32
    %c0_i32_1 = arith.constant 0 : i32
    return %c0_i32, %c0_i32_0 : i32, i32
  }
  func.func @transform_2(%arg0: i32) -> (i32, i32) {
    %c0_i32 = arith.constant 0 : i32
    %c0_i32_0 = arith.constant 0 : i32
    %c0_i32_1 = arith.constant 0 : i32
    return %c0_i32, %c0_i32_0 : i32, i32
  }
  func.func @transform_3(%arg0: i32) -> (i32, i32, i32) {
    %c0_i32 = arith.constant 0 : i32
    %c0_i32_0 = arith.constant 0 : i32
    %c0_i32_1 = arith.constant 0 : i32
    return %arg0, %c0_i32, %c0_i32_0 : i32, i32, i32
  }
  func.func @transform_4(%arg0: i32) -> (i32, i32, i32) {
    %c0_i32 = arith.constant 0 : i32
    %c0_i32_0 = arith.constant 0 : i32
    %c0_i32_1 = arith.constant 0 : i32
    return %arg0, %c0_i32, %c0_i32_0 : i32, i32, i32
  }
  func.func @transform_5(%arg0: i32) -> (i32, i32, i32) {
    %c0_i32 = arith.constant 0 : i32
    %c0_i32_0 = arith.constant 0 : i32
    %c0_i32_1 = arith.constant 0 : i32
    return %arg0, %c0_i32, %c0_i32_0 : i32, i32, i32
  }
  func.func @transform_6(%arg0: i32) -> (i32, i32, i32) {
    %c0_i32 = arith.constant 0 : i32
    %c0_i32_0 = arith.constant 0 : i32
    %c0_i32_1 = arith.constant 0 : i32
    return %arg0, %c0_i32, %c0_i32_0 : i32, i32, i32
  }
  func.func @transform_7(%arg0: i32) -> (i32, i32, i32) {
    %c0_i32 = arith.constant 0 : i32
    %c0_i32_0 = arith.constant 0 : i32
    %c0_i32_1 = arith.constant 0 : i32
    return %arg0, %c0_i32, %c0_i32_0 : i32, i32, i32
  }
  func.func @transform_8(%arg0: i32) -> (i32, i32, i32) {
    %c0_i32 = arith.constant 0 : i32
    %c0_i32_0 = arith.constant 0 : i32
    %c0_i32_1 = arith.constant 0 : i32
    return %arg0, %c0_i32, %c0_i32_0 : i32, i32, i32
  }
  func.func @transform_9(%arg0: i32) -> (i32, i32, i32) {
    %c0_i32 = arith.constant 0 : i32
    %c0_i32_0 = arith.constant 0 : i32
    %c0_i32_1 = arith.constant 0 : i32
    return %arg0, %c0_i32, %c0_i32_0 : i32, i32, i32
  }
  func.func @transform_10(%arg0: i32) -> (i32, i32, i32) {
    %c0_i32 = arith.constant 0 : i32
    %c0_i32_0 = arith.constant 0 : i32
    %c0_i32_1 = arith.constant 0 : i32
    return %arg0, %c0_i32, %c0_i32_0 : i32, i32, i32
  }
  func.func @transform_11(%arg0: i32) -> (i32, i32, i32) {
    %c0_i32 = arith.constant 0 : i32
    %c0_i32_0 = arith.constant 0 : i32
    %c0_i32_1 = arith.constant 0 : i32
    return %arg0, %c0_i32, %c0_i32_0 : i32, i32, i32
  }
  func.func @transform_12(%arg0: i32) -> (i32, i32, i32) {
    %c0_i32 = arith.constant 0 : i32
    %c0_i32_0 = arith.constant 0 : i32
    %c0_i32_1 = arith.constant 0 : i32
    return %arg0, %c0_i32, %c0_i32_0 : i32, i32, i32
  }
  func.func @transform_13(%arg0: i32) -> (i32, i32, i32) {
    %c0_i32 = arith.constant 0 : i32
    %c0_i32_0 = arith.constant 0 : i32
    %c0_i32_1 = arith.constant 0 : i32
    return %arg0, %c0_i32, %c0_i32_0 : i32, i32, i32
  }
  func.func @transform_14(%arg0: i32) -> (i32, i32, i32) {
    %c0_i32 = arith.constant 0 : i32
    %c0_i32_0 = arith.constant 0 : i32
    %c0_i32_1 = arith.constant 0 : i32
    return %arg0, %c0_i32, %c0_i32_0 : i32, i32, i32
  }
  func.func @transform_15(%arg0: i32) -> (i32, i32) {
    %c0_i32 = arith.constant 0 : i32
    %c0_i32_0 = arith.constant 0 : i32
    %c0_i32_1 = arith.constant 0 : i32
    return %c0_i32, %c0_i32_0 : i32, i32
  }
}

</mosaic_0001>

<bundles_post_ra>
// kernel: clinical_bert_forward.1
= control target key start
LH: loop header
LB: loop body
LE: loop exit
PB: predicated region body
PF: predicated region fallthrough
CT: control target
= control target key end

     0   :  { %s5133_s0 = inlined_call_operand.vmem [shape: f32[16,128], index: 0, kind: input, shape index: {}]   ;;  %s5134_s1 = inlined_call_operand.vmem [shape: f32[1,128], index: 1, kind: input, shape index: {}]   ;;  %s5135_s2 = inlined_call_operand.vmem [shape: f32[1,128], index: 2, kind: input, shape index: {}]   ;;  %s5136_s3 = inlined_call_operand.hbm [shape: bf16[2,128,384], index: 3, kind: input, shape index: {}]   ;;  %s5137_s4 = inlined_call_operand.vmem [shape: f32[2,1,384], index: 4, kind: input, shape index: {}]   ;;  %s5138_s5 = inlined_call_operand.vmem [shape: bf16[2,128,128], index: 5, kind: input, shape index: {}]   ;;  %s5139_s6 = inlined_call_operand.vmem [shape: f32[2,1,128], index: 6, kind: input, shape index: {}]   ;;  %s5140_s7 = inlined_call_operand.vmem [shape: f32[2,1,128], index: 7, kind: input, shape index: {}]   ;;  %s5141_s8 = inlined_call_operand.vmem [shape: f32[2,1,128], index: 8, kind: input, shape index: {}]   ;;  %s5142_s9 = inlined_call_operand.hbm [shape: bf16[2,128,512], index: 9, kind: input, shape index: {}]   ;;  %s5143_s10 = inlined_call_operand.vmem [shape: f32[2,1,512], index: 10, kind: input, shape index: {}]   ;;  %s5144_s11 = inlined_call_operand.hbm [shape: bf16[2,512,128], index: 11, kind: input, shape index: {}]   ;;  %s5145_s12 = inlined_call_operand.vmem [shape: f32[2,1,128], index: 12, kind: input, shape index: {}]   ;;  %s5146_s13 = inlined_call_operand.vmem [shape: f32[2,1,128], index: 13, kind: input, shape index: {}]   ;;  %s5147_s14 = inlined_call_operand.vmem [shape: f32[2,1,128], index: 14, kind: input, shape index: {}]   ;;  %s5148_s15 = inlined_call_operand.vmem [shape: f32[16,128], index: 15, kind: output, shape index: {}]  }
   0x1   :  { %5158 = sst [smem:[#allocation12_spill]] %s5133_s0 }
   0x2   :  { %5159 = sst [smem:[#allocation13_spill]] %s5134_s1 }
   0x3   :  { %5160 = sst [smem:[#allocation14_spill]] %s5135_s2 }
   0x4   :  { %5161 = sst [smem:[#allocation15_spill]] %s5136_s3 }
   0x5   :  { %5162 = sst [smem:[#allocation16_spill]] %s5137_s4 }
   0x6   :  { %5163 = sst [smem:[#allocation17_spill]] %s5138_s5 }
   0x7   :  { %5164 = sst [smem:[#allocation18_spill]] %s5142_s9 }
   0x8   :  { %5165 = sst [smem:[#allocation19_spill]] %s5144_s11 }
   0x9   :  { %5166 = sst [smem:[#allocation20_spill]] %s5146_s13 }
   0xa   :  { %5167 = sst [smem:[#allocation21_spill]] %s5147_s14 }
   0xb   :  { %5168 = sst [smem:[#allocation22_spill]] %s5148_s15 }
   0xc   :  { %20 = vsyncpa [#allocation3], 0 }
   0xd   :  { %22 = vsyncpa [#allocation3 + $0x1], 0 }
   0xe   :  { %23 = vsyncpa [#allocation5], 0 }
   0xf   :  { %25 = vsyncpa [#allocation5 + $0x1], 0  ;;  %s4464_s18 = smov 0   ;;  %s4466_s19 = smov 0  }
  0x10   :  { %s4468_s20 = smov 0   ;;  %s4470_s21 = smov 0  }
  0x11 LB: > { %5169 = sst [smem:[#allocation9_spill]] %s4363_s20  ;;  %s4483_s22 = sadd.s32 4294967295, %s4367_s21   ;;  %s4367_s21 = sphi %s4470_s21, %s5196_s21   ;;  %s4363_s20 = sphi %s4468_s20, %s5198_s20   ;;  %s4359_s19 = sphi %s4466_s19, %s5200_s19   ;;  %s4355_s18 = sphi %s4464_s18, %s5199_s18  }
  0x12   : > { %s4486_s23 = sadd.s32 1, %s4367_s21   ;;  %s101_s25 = sadd.s32 1, %s4363_s20 }
  0x13   : > { %5170 = sst [smem:[#allocation10_spill]] %s4486_s23  ;;  %s98_s24 = ssub.s32 %s4367_s21, %s4486_s23 }
  0x14   : > { %p99_p0 = scmp.eq.s32.totalorder %s98_s24, 0  ;;  %p108_p1 = scmp.ne.s32.totalorder %s4363_s20, %s4359_s19 }
  0x15   : > { %p109_p2 = scmp.eq.s32.totalorder %s4367_s21, 0  ;;  %p114_p3 = scmp.ne.s32.totalorder %s4359_s19, %s4355_s18 }
  0x16   : > { %s4496_s26 = scalar_select %p99_p0, %s4363_s20, %s101_s25  }
  0x17   : > { %p110_p4 = por %p109_p2, %p108_p1  ;;  %p115_p5 = scmp.eq.s32.totalorder %s4483_s22, 0 }
  0x18   : > { %5171 = sst [smem:[#allocation11_spill]] %s4496_s26  ;;  %p4029_p6 = scmp.lt.s32.totalorder %s4367_s21, 2 }
  0x19   : > { %p4500_p7 = por %p115_p5, %p114_p3  ;;  %s4505_s28 = sand.u32 1, %s4363_s20  }
  0x1a   : > { %p4507_p8 = pnand %p4029_p6, %p110_p4  ;;  %s508_s30 = sand.u32 1, %s4367_s21  }
  0x1b   : > { %s5172_s27 = scalar_select %p4500_p7, 1, 0 }
  0x1c   : > { %s5154_s16 = sshll.u32 %s4505_s28, 8  ;;  %s5155_s17 = sshll.u32 %s4367_s21, 12 }
  0x1d   : > { %s512_s18 = scalar_lea.vmem [#allocation4], %s5154_s16  ;;  %s5174_s9 = sld [smem:[#allocation18_spill]] }
  0x1e   : > { %s519_s24 = sshll.u32 %s512_s18, 4  ;;  %s4525_s20 = scalar_lea.sflag [#allocation5], %s508_s30  ;;  %s4523_s24 = int_to_ptr.vmem [resolvable:$true] %s519_s24 }
  0x1f   : > { %p4531_p10 = pneg %p4507_p8 }
  0x23   : > { %s4521_s23 = scalar_lea.hbm %s5174_s9, %s5155_s17  ;;  %s4250_s25 = scalar_lea.hbm %s5174_s9, 8192 }
  0x24   : > { %s4245_s15 = scalar_lea.hbm %s4521_s23, 4096  ;;  %p4251_p13 = scmp.lt.s32.totalorder %s4521_s23, %s5174_s9 }
  0x25   : > { %p4246_p9 = scmp.ne.s32.totalorder %s4521_s23, %s4245_s15  ;;  %p4252_p0 = scmp.lt.s32.totalorder %s4250_s25, %s4245_s15 }
  0x27   : > { %p4248_p11 = pnand %p4531_p10, %p4246_p9  ;;  %p4253_p1 = por %p4252_p0, %p4251_p13 }
  0x29   : > { %p4249_p12 = pneg %p4248_p11 }
  0x2b   : > { %p4254_p2 = pnand %p4253_p1, %p4249_p12 }
  0x2d   : > { %4257 = shalt.err (!%p4254_p2)
}
  0x2e   : > { %s4258_s30 = scalar_lea.vmem %s4523_s24, 4096  ;;  %s4369_s1 = smov [#allocation4]  }
  0x2f   : > { %p4259_p3 = scmp.ne.s32.totalorder %s4523_s24, %s4258_s30  ;;  %s4263_s26 = sshll.u32 %s4369_s1, 4  ;;  %s4264_s26 = int_to_ptr.vmem [resolvable:$false] %s4263_s26 }
  0x30   : > { %s4265_s18 = scalar_lea.vmem %s4264_s26, 8192  ;;  %p4266_p6 = scmp.lt.s32.totalorder %s4523_s24, %s4264_s26 }
  0x31   : > { %p4261_p4 = pnand %p4259_p3, %p4531_p10  ;;  %p4267_p9 = scmp.lt.s32.totalorder %s4265_s18, %s4258_s30 }
  0x33   : > { %p4262_p5 = pneg %p4261_p4  ;;  %p4268_p11 = por %p4267_p9, %p4266_p6 }
  0x35   : > { %p4269_p7 = pnand %p4268_p11, %p4262_p5 }
  0x37   : > { %4272 = shalt.err (!%p4269_p7)
}
  0x38   : > { %s4370_s15 = smov 256   ;;  %s4371_s1 = smov 16  }
  0x39   : > { %4025 = dma.hbm_to_vmem [thread:$0]  (!%p4507_p8), %s4521_s23, 4096, %s4523_s24, %s4525_s20, %s4370_s15, %s4370_s15, %s4371_s1  }
  0x3a   : > { %s5176_s16 = sshll.u32 %s4367_s21, 12  ;;  %s5177_s11 = sld [smem:[#allocation19_spill]] }
  0x3b   : > { %s5178_s26 = sshll.u32 %s4505_s28, 8  ;;  %p3707_p7 = scmp.ge.s32.totalorder %s4367_s21, 1 }
  0x3c   : > { %s540_s18 = scalar_lea.vmem [#allocation6], %s5178_s26  ;;  %p573_p12 = scmp.lt.s32.totalorder %s4367_s21, 3 }
  0x3d   : > { %s547_s9 = sshll.u32 %s540_s18, 4  ;;  %s4009_s0 = smul.u32 192, %s4505_s28  ;;  %s4564_s9 = int_to_ptr.vmem [resolvable:$true] %s547_s9 }
  0x3e   : > { %p4568_p13 = pnand %p3707_p7, %p573_p12  ;;  %s4010_s23 = smul.u32 3072, %s4367_s21 }
  0x3f   : > { %s5180_s3 = sld [smem:[#allocation15_spill]]  ;;  %s455_s25 = scalar_lea.sflag [#allocation3], %s4505_s28 }
  0x40   : > { %s4559_s30 = scalar_lea.hbm %s5177_s11, %s5176_s16  ;;  %s458_s16 = scalar_lea.vmem [#allocation2], %s4009_s0 }
  0x41   : > { %s5179_s14 = scalar_select %p4568_p13, 1, 0 }
  0x42   : > { %s465_s17 = sshll.u32 %s458_s16, 4  ;;  %s4578_s17 = int_to_ptr.vmem [resolvable:$true] %s465_s17 }
  0x45   : > { %s4576_s1 = scalar_lea.hbm %s5180_s3, %s4010_s23  ;;  %s4278_s13 = scalar_lea.hbm %s5180_s3, 6144 }
  0x46   : > { %s4273_s26 = scalar_lea.hbm %s4576_s1, 3072  ;;  %p4279_p3 = scmp.lt.s32.totalorder %s4576_s1, %s5180_s3 }
  0x47   : > { %p4274_p0 = scmp.ne.s32.totalorder %s4576_s1, %s4273_s26  ;;  %p4280_p4 = scmp.lt.s32.totalorder %s4278_s13, %s4273_s26 }
  0x49   : > { %p4276_p1 = pnand %p4274_p0, %p4531_p10  ;;  %p4281_p5 = por %p4280_p4, %p4279_p3 }
  0x4b   : > { %p4277_p2 = pneg %p4276_p1 }
  0x4d   : > { %p4282_p6 = pnand %p4281_p5, %p4277_p2 }
  0x4f   : > { %4285 = shalt.err (!%p4282_p6)
}
  0x50   : > { %s4286_s0 = scalar_lea.vmem %s4578_s17, 3072  ;;  %s4372_s15 = smov [#allocation2]  }
  0x51   : > { %p4287_p9 = scmp.ne.s32.totalorder %s4578_s17, %s4286_s0  ;;  %s4291_s16 = sshll.u32 %s4372_s15, 4  ;;  %s4292_s16 = int_to_ptr.vmem [resolvable:$false] %s4291_s16 }
  0x52   : > { %s4293_s18 = scalar_lea.vmem %s4292_s16, 6144  ;;  %p4294_p12 = scmp.lt.s32.totalorder %s4578_s17, %s4292_s16 }
  0x53   : > { %p4289_p11 = pnand %p4287_p9, %p4531_p10  ;;  %p4295_p0 = scmp.lt.s32.totalorder %s4293_s18, %s4286_s0 }
  0x55   : > { %p4290_p7 = pneg %p4289_p11  ;;  %p4296_p1 = por %p4295_p0, %p4294_p12 }
  0x57   : > { %p4297_p13 = pnand %p4296_p1, %p4290_p7 }
  0x59   : > { %4300 = shalt.err (!%p4297_p13)
}
  0x5a   : > { %s4373_s13 = smov 192   ;;  %s4374_s26 = smov 12  }
  0x5b   : > { %4022 = dma.hbm_to_vmem [thread:$0]  (!%p4507_p8), %s4576_s1, 3072, %s4578_s17, %s455_s25, %s4373_s13, %s4373_s13, %s4374_s26  }
  0x5c   : > { %s4301_s21 = scalar_lea.hbm %s4559_s30, 4096  ;;  %s4306_s0 = scalar_lea.hbm %s5177_s11, 8192 }
  0x5d   : > { %p4302_p2 = scmp.ne.s32.totalorder %s4559_s30, %s4301_s21  ;;  %p4307_p13 = scmp.lt.s32.totalorder %s4559_s30, %s5177_s11 }
  0x5e   : > { %p4308_p5 = scmp.lt.s32.totalorder %s4306_s0, %s4301_s21 }
  0x5f   : > { %p4304_p3 = pnand %p4302_p2, %p4531_p10 }
  0x60   : > { %p4309_p6 = por %p4308_p5, %p4307_p13 }
  0x61   : > { %p4305_p4 = pneg %p4304_p3 }
  0x63   : > { %p4310_p9 = pnand %p4309_p6, %p4305_p4 }
  0x65   : > { %4313 = shalt.err (!%p4310_p9)
}
  0x66   : > { %s4314_s28 = scalar_lea.vmem %s4564_s9, 4096  ;;  %s4375_s1 = smov [#allocation6]  }
  0x67   : > { %p4315_p11 = scmp.ne.s32.totalorder %s4564_s9, %s4314_s28  ;;  %s4319_s17 = sshll.u32 %s4375_s1, 4  ;;  %s4320_s17 = int_to_ptr.vmem [resolvable:$false] %s4319_s17 }
  0x68   : > { %s4321_s25 = scalar_lea.vmem %s4320_s17, 8192  ;;  %p4322_p0 = scmp.lt.s32.totalorder %s4564_s9, %s4320_s17 }
  0x69   : > { %p4317_p7 = pnand %p4315_p11, %p4531_p10  ;;  %p4323_p1 = scmp.lt.s32.totalorder %s4321_s25, %s4314_s28 }
  0x6b   : > { %p4318_p12 = pneg %p4317_p7  ;;  %p4324_p2 = por %p4323_p1, %p4322_p0 }
  0x6d   : > { %p4325_p3 = pnand %p4324_p2, %p4318_p12 }
  0x6f   : > { %4328 = shalt.err (!%p4325_p3)
}
  0x70   : > { %s4376_s18 = smov 64   ;;  %s4377_s13 = smov 4  }
  0x71   : > { %4028 = dma.hbm_to_vmem [thread:$0]  (!%p4507_p8), %s4559_s30, 4096, %s4564_s9, %s4525_s20, %s4376_s18, %s4376_s18, %s4377_s13  }
  0x72   : > { %p5181_p10 = scmp.ne.s32.totalorder %s5179_s14, 0 }
  0x73   : > { %s579_s2 = sand.u32 (!%p5181_p10), 1, %s4359_s19   ;;  %p5182_p4 = scmp.ne.s32.totalorder (!%p5181_p10), %s5172_s27, 0 }
  0x74   : > { %577 = sbr.rel (%p5181_p10) target bundleno = 2933 (0xb75), region = 80  ;;  %s580_s21 = scalar_lea.sflag (!%p5181_p10), [#allocation3], %s579_s2 }
  0x75   : > { %s4011_s26 = smul.u32 (!%p5181_p10), 192, %s579_s2 }
  0x77   : > { %s4627_s24 = scalar_lea.vmem (!%p5181_p10), [#allocation2], %s4011_s26 }
  0x79   : > { %4346 = dma.done.wait (%p5182_p4), %s580_s21, 3072  }
  0x7a   : > { %4348 = vsyncadd (%p5182_p4), %s580_s21, 4294964224  ;;  %s588_s23 = sand.u32 1, %s4483_s22   ;;  %s3708_s29 = sshll.u32 %s579_s2, 8 }
  0x7b   : > { %s589_s9 = scalar_lea.sflag [#allocation5], %s588_s23  ;;  %s4634_s20 = scalar_lea.vmem [#allocation4], %s3708_s29 }
  0x7c   : > { %4350 = dma.done.wait (%p5182_p4), %s589_s9, 8192  }
  0x7d   : > { %4352 = vsyncadd (%p5182_p4), %s589_s9, 4294959104  ;;  %p684_p8 = scmp.lt.s32.totalorder %s4483_s22, 1  ;;  %s5183_s5 = sld [smem:[#allocation17_spill]] }
  0x7e   : > { %s5184_s4 = sld [smem:[#allocation16_spill]]  ;;  %s4686_s23 = scalar_lea.vmem [#allocation6], %s3708_s29 }
  0x7f   : > { %s4642_s14 = scalar_select %p684_p8, %s4483_s22, 1 }
  0x80   : > { %s5185_s17 = sld [smem:[#allocation20_spill]]  ;;  %p3713_p13 = scmp.ne.s32.totalorder %s4483_s22, 0 }
  0x81   : > { %s4012_s30 = smul.u32 3, %s4642_s14  ;;  %s3850_s0 = sshll.u32 %s4642_s14, 6 }
  0x82   : > { %s701_s3 = scalar_lea.vmem %s5141_s8, %s4642_s14  ;;  %s3712_s15 = sshll.u32 %s4642_s14, 2 }
  0x83   : > { %s4649_s27 = scalar_lea.vmem %s5183_s5, %s3850_s0  ;;  %s4672_s5 = scalar_lea.vmem %s5143_s10, %s3712_s15 }
  0x84   : > { %s4658_s13 = scalar_lea.vmem %s5184_s4, %s4012_s30  ;;  %s708_s25 = scalar_lea.vmem %s5145_s12, %s4642_s14 }
  0x85   : > { %s5186_s21 = sld [smem:[#allocation21_spill]] }
  0x86   : > { %s711_s4 = scalar_lea.vmem %s5185_s17, %s4642_s14  ;;  %s5187_s0 = sld [smem:[#allocation12_spill]] (!%p3713_p13) }
  0x87   : > { %719 = sbr.rel (%p3713_p13) target bundleno = 452 (0x1c4), region = 96  ;;  %s5188_s17 = sld [smem:[#allocation13_spill]] (!%p3713_p13) }
  0x88   : > { %s5189_s30 = sld [smem:[#allocation14_spill]] (!%p3713_p13) }
  0x89   : > { %s5190_s26 = sld [smem:[#allocation22_spill]] (!%p3713_p13) }
  0x8b   : > { %s714_s11 = scalar_lea.vmem %s5186_s21, %s4642_s14 }
  0x8c   : > { %v720_v0 = vld [vmem:[%s5187_s0] sm:$0xff]  ;;  %v721_v1 = vld [vmem:[%s5187_s0 + $0x8] sm:$0xff] }
  0x8d   : > { %724 = vadd.xlane.f32.xlu0 %v720_v0  ;;  %v3714_v17 = vld [vmem:[%s5188_s17] ss:$0 sm:$0xff] }
  0x8e   : > { %v3715_v19 = vld [vmem:[%s5189_s30] ss:$0 sm:$0xff] }
  0x91   : > { %726 = vadd.xlane.f32.xlu0 %v721_v1 }
 0x116   : > { %v725_v2 = vpop.xlane.xlu0 %724 }
 0x117   : > { %v729_v3 = vmul.f32 0.0078125, %v725_v2 }
 0x119   : > { %v731_v4 = vsub.f32 %v720_v0, %v729_v3 }
 0x11a   : > { %v727_v5 = vpop.xlane.xlu0 %726 }
 0x11b   : > { %v730_v6 = vmul.f32 0.0078125, %v727_v5  ;;  %v733_v7 = vmul.f32 %v731_v4, %v731_v4 }
 0x11d   : > { %v732_v8 = vsub.f32 %v721_v1, %v730_v6  ;;  %735 = vadd.xlane.f32.xlu1 %v733_v7 }
 0x11f   : > { %v734_v9 = vmul.f32 %v732_v8, %v732_v8 }
 0x121   : > { %737 = vadd.xlane.f32.xlu1 %v734_v9 }
 0x1a6   : > { %v736_v10 = vpop.xlane.xlu1 %735 }
 0x1a7   : > { %v739_v11 = vmul.f32 0.0078125, %v736_v10 }
 0x1a9   : > { %v741_v12 = vadd.f32 1e-12, %v739_v11 }
 0x1aa   : > { %v738_v13 = vpop.xlane.xlu1 %737 }
 0x1ab   : > { %4074 = vrsqrt.f32 %v741_v12  ;;  %v740_v14 = vmul.f32 0.0078125, %v738_v13 }
 0x1ad   : > { %v742_v15 = vadd.f32 1e-12, %v740_v14 }
 0x1af   : > { %4076 = vrsqrt.f32 %v742_v15 }
 0x1b8   : > { %v4075_v16 = vpop.eup %4074 }
 0x1b9   : > { %v745_v18 = vmul.f32 %v4075_v16, %v731_v4 }
 0x1bb   : > { %v753_v20 = vmul.f32 %v3714_v17, %v745_v18 }
 0x1bc   : > { %v4077_v21 = vpop.eup %4076 }
 0x1bd   : > { %v761_v22 = vadd.f32 %v3715_v19, %v753_v20  ;;  %v746_v23 = vmul.f32 %v4077_v21, %v732_v8 }
 0x1bf   : > { %763 = vst [vmem:[%s5190_s26] sm:$0xff] %v761_v22  ;;  %v754_v24 = vmul.f32 %v3714_v17, %v746_v23 }
 0x1c1   : > { %v762_v25 = vadd.f32 %v3715_v19, %v754_v24 }
 0x1c3   : > { %764 = vst [vmem:[%s5190_s26 + $0x8] sm:$0xff] %v762_v25 }
 0x1c4 PF: > { %v4083_v26 = vld [vmem:[%s4627_s24 + $0xac] ss:$12 sps:$4 sm:$0xff]   ;;  %v4085_v27 = vld [vmem:[%s4627_s24 + $0xa8] ss:$12 sps:$4 sm:$0xff]   ;;  %v4378_v28 = vmov 0   ;;  %s5191_s22 = sld [smem:[#allocation22_spill]]  ;;  %v802_v53 = vlaneseq  ;;  %s5193_s9 = scalar_lea.vmem %s5140_s7, %s4642_s14 }
 0x1c5   : > { %977 = vmatprep.mubr.bf16.mxu0 %v4378_v28  ;;  %945 = vmatprep.subr.bf16.mxu0 %v4083_v26  ;;  %v4086_v29 = vld [vmem:[%s4627_s24 + $0x94] ss:$12 sps:$4 sm:$0xff]   ;;  %v4088_v30 = vld [vmem:[%s4627_s24 + $0x90] ss:$12 sps:$4 sm:$0xff]   ;;  %v4091_v32 = vld [vmem:[%s4627_s24 + $0x78] ss:$12 sps:$4 sm:$0xff]  }
 0x1c6   : > { %946 = vmatpush1.bf16.msra.mxu0 %v4085_v27  ;;  %v4089_v31 = vld [vmem:[%s4627_s24 + $0x7c] ss:$12 sps:$4 sm:$0xff]   ;;  %v4092_v33 = vld [vmem:[%s4627_s24 + $0x64] ss:$12 sps:$4 sm:$0xff]   ;;  %v4094_v34 = vld [vmem:[%s4627_s24 + $0x60] ss:$12 sps:$4 sm:$0xff]  }
 0x1c7   : > { %947 = vmatprep.subr.bf16.mxu0 %v4086_v29  ;;  %v4095_v35 = vld [vmem:[%s4627_s24 + $0x4c] ss:$12 sps:$4 sm:$0xff]   ;;  %v4097_v36 = vld [vmem:[%s4627_s24 + $0x48] ss:$12 sps:$4 sm:$0xff]   ;;  %v4100_v38 = vld [vmem:[%s4627_s24 + $0x30] ss:$12 sps:$4 sm:$0xff]  }
 0x1c8   : > { %v4098_v37 = vld [vmem:[%s4627_s24 + $0x34] ss:$12 sps:$4 sm:$0xff]   ;;  %v4101_v39 = vld [vmem:[%s4627_s24 + $0x1c] ss:$12 sps:$4 sm:$0xff]   ;;  %v4103_v40 = vld [vmem:[%s4627_s24 + $0x18] ss:$12 sps:$4 sm:$0xff]  }
 0x1c9   : > { %v4104_v41 = vld [vmem:[%s4627_s24 + $0x4] ss:$12 sps:$4 sm:$0xff]   ;;  %v4106_v42 = vld [vmem:[%s4627_s24] ss:$12 sps:$4 sm:$0xff]   ;;  %v4379_v46 = vmov 0.0   ;;  %v4744_v54 = vshrl.u32 %v802_v53, 7 }
 0x1ca   : > { %948 = vmatpush1.bf16.msra.mxu0 %v4088_v30  ;;  %v765_v43 = vld [vmem:[%s5191_s22] sm:$0xff]  ;;  %v766_v44 = vld [vmem:[%s5191_s22 + $0x8] sm:$0xff]  ;;  %3929 = vmatprep.subr.bf16.mxu1 %v4379_v46  ;;  %v4107_v47 = vld [vmem:[%s4627_s24 + $0xb0] ss:$12 sps:$4 sm:$0xff]   ;;  %s4380_s21 = smov 64   ;;  %vm4381_vm0 = vmmov 0  }
 0x1cb   : > { %949 = vmatprep.subr.bf16.mxu0 %v4089_v31  ;;  %v767_v45 = vpack.c.bf16 %v766_v44, %v765_v43  ;;  %3930 = vmatpush3.bf16.msra.mxu1 %v4107_v47  ;;  %v4108_v48 = vld [vmem:[%s4627_s24 + $0x98] ss:$12 sps:$4 sm:$0xff]   ;;  %v4109_v49 = vld [vmem:[%s4627_s24 + $0x80] ss:$12 sps:$4 sm:$0xff]   ;;  %v4110_v50 = vld [vmem:[%s4627_s24 + $0x68] ss:$12 sps:$4 sm:$0xff]  }
 0x1cc   : > { %3931 = vmatprep.subr.bf16.mxu1 %v4379_v46  ;;  %v4111_v51 = vld [vmem:[%s4627_s24 + $0x50] ss:$12 sps:$4 sm:$0xff]   ;;  %v4112_v52 = vld [vmem:[%s4627_s24 + $0x38] ss:$12 sps:$4 sm:$0xff]   ;;  %v4113_v55 = vld [vmem:[%s4627_s24 + $0x20] ss:$12 sps:$4 sm:$0xff]   ;;  %3945 = vmatprep.mubr.msk.bf16.mxu1 %vm4381_vm0, %v4379_v46 }
 0x1cd   : > { %v804_v56 = vsub.s32 0, %v4744_v54  ;;  %v808_v57 = vsub.s32 1, %v4744_v54  ;;  %v4751_v58 = vld [vmem:[%s4658_s13] sm:$0x7]  ;;  %v4114_v62 = vld [vmem:[%s4627_s24 + $0x8] ss:$12 sps:$4 sm:$0xff]   ;;  %s5192_s13 = scalar_lea.vmem %s5139_s6, %s4642_s14 }
 0x1ce   : > { %950 = vmatpush1.bf16.msra.mxu0 %v4091_v32  ;;  %v4382_v8 = vmov 1983009808   ;;  %v4383_v11 = vmov 1934713408   ;;  %vm1751_vm1 = vcmask 523264   ;;  %vm2056_vm2 = vcmask 64512  }
 0x1cf   : > { %951 = vmatprep.subr.bf16.mxu0 %v4092_v33  ;;  %3932 = vmatpush3.bf16.msra.mxu1 %v4108_v48  ;;  %v805_v59 = vrot.slane %v4751_v58, %v804_v56  ;;  %v809_v60 = vrot.slane %v4751_v58, %v808_v57  ;;  %v1041_v9 = vunpack.c.l.s4 %v4382_v8  ;;  %v1072_v12 = vunpack.c.l.s4 %v4383_v11 }
 0x1d0   : > { %3933 = vmatprep.subr.bf16.mxu1 %v4379_v46 }
 0x1d1   : > { %v1042_v10 = vunpack.c.0.s8 %v1041_v9  ;;  %v1073_v14 = vunpack.c.0.s8 %v1072_v12 }
 0x1d2   : > { %952 = vmatpush1.bf16.msra.mxu0 %v4094_v34 }
 0x1d3   : > { %953 = vmatprep.subr.bf16.mxu0 %v4095_v35  ;;  %3934 = vmatpush3.bf16.msra.mxu1 %v4109_v49  ;;  %v4772_v13 = vsub.s32 %v1042_v10, %v4744_v54  ;;  %v4777_v18 = vsub.s32 %v1073_v14, %v4744_v54 }
 0x1d4   : > { %3935 = vmatprep.subr.bf16.mxu1 %v4379_v46 }
 0x1d6   : > { %954 = vmatpush1.bf16.msra.mxu0 %v4097_v36 }
 0x1d7   : > { %955 = vmatprep.subr.bf16.mxu0 %v4098_v37  ;;  %3936 = vmatpush3.bf16.msra.mxu1 %v4110_v50 }
 0x1d8   : > { %3937 = vmatprep.subr.bf16.mxu1 %v4379_v46 }
 0x1da   : > { %956 = vmatpush1.bf16.msra.mxu0 %v4100_v38 }
 0x1db   : > { %957 = vmatprep.subr.bf16.mxu0 %v4101_v39  ;;  %3938 = vmatpush3.bf16.msra.mxu1 %v4111_v51 }
 0x1dc   : > { %3939 = vmatprep.subr.bf16.mxu1 %v4379_v46 }
 0x1de   : > { %958 = vmatpush1.bf16.msra.mxu0 %v4103_v40 }
 0x1df   : > { %959 = vmatprep.subr.bf16.mxu0 %v4104_v41  ;;  %3940 = vmatpush3.bf16.msra.mxu1 %v4112_v52 }
 0x1e0   : > { %3941 = vmatprep.subr.bf16.mxu1 %v4379_v46 }
 0x1e2   : > { %960 = vmatpush1.bf16.msra.mxu0 %v4106_v42 }
 0x1e3   : > { %3989 = vmatprep.subr.bf16.mxu0 %v4379_v46  ;;  %3942 = vmatpush3.bf16.msra.mxu1 %v4113_v55 }
 0x1e4   : > { %3943 = vmatprep.subr.bf16.mxu1 %v4379_v46 }
 0x1e5   : > { %978 = vmatmul.mubr.bf16.vlgmr.msra.gmra.mxu0 %v767_v45 }
 0x1e6   : > { %4005 = vmatprep.mubr.msk.bf16.mxu0 %vm4381_vm0, %v4379_v46 }
 0x1e7   : > { %3944 = vmatpush3.bf16.msra.mxu1 %v4114_v62 }
 0x1e8   : > { %3949 = vmatprep.subr.mxu1 %v4379_v46 }
 0x1ea   : > { %3946 = vmatmul.mubr.bf16.vlgmr.msra.gmra.mxu1 %v767_v45 }
 0x1eb   : > { %3951 = vmatprep.mubr.msk.f32.mxu1 %vm4381_vm0, %v4379_v46 }
 0x2a5   : > { %v979_v61 = vpop.f32.mrf.mxu0 }
 0x2a6   : > { %v980_v0 = vadd.f32 %v979_v61, %v805_v59 }
 0x2a7   : > { %v981_v63 = vpop.f32.mrf.mxu0 }
 0x2a8   : > { %v982_v1 = vadd.f32 %v981_v63, %v809_v60  ;;  %v1029_v4 = vmul.f32 0.125, %v980_v0 }
 0x2a9   : > { %v983_v2 = vpop.f32.mrf.mxu0 }
 0x2aa   : > { %1273 = vrot.lane.b32.xlu0 %v982_v1, %s4380_s21  ;;  %v984_v5 = vadd.f32 %v983_v2, %v805_v59  ;;  %v1279_v15 = vcombine.high %v982_v1, %v4379_v46  ;;  %v1286_v19 = vrot.slane %v982_v1, %v4772_v13  ;;  %v1039_v22 = vcombine.high %v1029_v4, %v4379_v46 }
 0x2ab   : > { %v985_v3 = vpop.f32.mrf.mxu0  ;;  %v1046_v27 = vrot.slane %v1029_v4, %v4772_v13 }
 0x2ac   : > { %v986_v6 = vadd.f32 %v985_v3, %v809_v60  ;;  %v1030_v7 = vmul.f32 0.125, %v984_v5  ;;  %v1293_v23 = vrot.slane %v1279_v15, %v4772_v13  ;;  %v1053_v9 = vrot.slane %v1039_v22, %v4772_v13 }
 0x2ae   : > { %1275 = vrot.lane.b32.xlu1 %v986_v6, %s4380_s21  ;;  %1033 = vrot.lane.b32.xlu0 %v1029_v4, %s4380_s21  ;;  %v1345_v16 = vcombine.high %v986_v6, %v4379_v46  ;;  %v1105_v29 = vcombine.high %v1030_v7, %v4379_v46  ;;  %v1352_v30 = vrot.slane %v986_v6, %v4772_v13 }
 0x2af   : > { %v1112_v10 = vrot.slane %v1030_v7, %v4772_v13 }
 0x2b0   : > { %v1359_v31 = vrot.slane %v1345_v16, %v4772_v13  ;;  %v1119_v14 = vrot.slane %v1105_v29, %v4772_v13 }
 0x2b2   : > { %1035 = vrot.lane.b32.xlu1 %v1030_v7, %s4380_s21 }
 0x31c   : > { %v1274_v17 = vpop.permute.xlu0 %1273 }
 0x31d   : > { %v1294_v20 = vcombine.high %v1274_v17, %v4379_v46  ;;  %v1301_v21 = vrot.slane %v1274_v17, %v4772_v13 }
 0x31f   : > { %v1308_v24 = vrot.slane %v1294_v20, %v4772_v13  ;;  %v1309_v25 = vcombine.low %v1286_v19, %v1301_v21  ;;  %v1310_v26 = vcombine.high %v1286_v19, %v1301_v21 }
 0x320   : > { %v1276_v32 = vpop.permute.xlu1 %1275  ;;  %v1034_v33 = vpop.permute.xlu0 %1033 }
 0x321   : > { %v1317_v34 = vrot.slane %v1309_v25, %v4777_v18  ;;  %v1324_v35 = vrot.slane %v1310_v26, %v4777_v18  ;;  %v1325_v36 = vcombine.low %v1293_v23, %v1308_v24  ;;  %v1326_v37 = vcombine.high %v1293_v23, %v1308_v24 }
 0x322   : > { %v1360_v38 = vcombine.high %v1276_v32, %v4379_v46  ;;  %v1367_v39 = vrot.slane %v1276_v32, %v4772_v13  ;;  %v1054_v40 = vcombine.high %v1034_v33, %v4379_v46  ;;  %v1061_v41 = vrot.slane %v1034_v33, %v4772_v13 }
 0x323   : > { %v1333_v42 = vrot.slane %v1325_v36, %v4777_v18  ;;  %v1340_v43 = vrot.slane %v1326_v37, %v4777_v18  ;;  %v1411_v44 = vcombine.low %v1317_v34, %v1324_v35  ;;  %v3744_v45 = vcombine.high %v1317_v34, %v1324_v35 }
 0x324   : > { %v1374_v47 = vrot.slane %v1360_v38, %v4772_v13  ;;  %v1375_v48 = vcombine.low %v1352_v30, %v1367_v39  ;;  %v1376_v49 = vcombine.high %v1352_v30, %v1367_v39  ;;  %v1068_v50 = vrot.slane %v1054_v40, %v4772_v13  ;;  %v1036_v8 = vpop.permute.xlu1 %1035 }
 0x325   : > { %v1418_v51 = vrot.slane %v1411_v44, %v4772_v13  ;;  %v1426_v52 = vrot.slane %v3744_v45, %v4772_v13  ;;  %v1427_v53 = vcombine.low %v1333_v42, %v1340_v43  ;;  %v3745_v55 = vcombine.high %v1333_v42, %v1340_v43 }
 0x326   : > { %v1383_v59 = vrot.slane %v1375_v48, %v4777_v18  ;;  %v1390_v60 = vrot.slane %v1376_v49, %v4777_v18  ;;  %v1391_v61 = vcombine.low %v1359_v31, %v1374_v47  ;;  %v1392_v62 = vcombine.high %v1359_v31, %v1374_v47 }
 0x327   : > { %v1434_v63 = vrot.slane %v1427_v53, %v4772_v13  ;;  %v1442_v0 = vrot.slane %v3745_v55, %v4772_v13  ;;  %v1443_v1 = vcombine.low %v1418_v51, %v1426_v52  ;;  %v1069_v2 = vcombine.low %v1046_v27, %v1061_v41 }
 0x328   : > { %v1399_v3 = vrot.slane %v1391_v61, %v4777_v18  ;;  %v1406_v4 = vrot.slane %v1392_v62, %v4777_v18  ;;  %v1461_v5 = vcombine.low %v1383_v59, %v1390_v60  ;;  %v3746_v6 = vcombine.high %v1383_v59, %v1390_v60 }
 0x329   : > { %v1070_v11 = vcombine.high %v1046_v27, %v1061_v41  ;;  %v1077_v12 = vrot.slane %v1069_v2, %v4777_v18  ;;  %v1450_v15 = vrot.slane %v1443_v1, %v4777_v18  ;;  %v1085_v20 = vcombine.low %v1053_v9, %v1068_v50 }
 0x32a   : > { %v1477_v16 = vcombine.low %v1399_v3, %v1406_v4  ;;  %v3747_v17 = vcombine.high %v1399_v3, %v1406_v4  ;;  %v1086_v21 = vcombine.high %v1053_v9, %v1068_v50  ;;  %v1120_v23 = vcombine.high %v1036_v8, %v4379_v46 }
 0x32b   : > { %v1084_v19 = vrot.slane %v1070_v11, %v4777_v18  ;;  %v1451_v24 = vcombine.low %v1434_v63, %v1442_v0  ;;  %v1468_v22 = vrot.slane %v1461_v5, %v4772_v13  ;;  %v1476_v7 = vrot.slane %v3746_v6, %v4772_v13 }
 0x32c   : > { %v1127_v25 = vrot.slane %v1036_v8, %v4772_v13  ;;  %v1093_v26 = vrot.slane %v1085_v20, %v4777_v18  ;;  %v1100_v27 = vrot.slane %v1086_v21, %v4777_v18  ;;  %v1484_v31 = vrot.slane %v1477_v16, %v4772_v13  ;;  %v1022_v21 = vpop.f32.mrf.mxu1 }
 0x32d   : > { %v1171_v29 = vcombine.low %v1077_v12, %v1084_v19  ;;  %v3740_v30 = vcombine.high %v1077_v12, %v1084_v19  ;;  %v1492_v32 = vrot.slane %v3747_v17, %v4772_v13  ;;  %v1134_v33 = vrot.slane %v1120_v23, %v4772_v13 }
 0x32e   : > { %v1135_v34 = vcombine.low %v1112_v10, %v1127_v25  ;;  %v1187_v37 = vcombine.low %v1093_v26, %v1100_v27  ;;  %v3741_v38 = vcombine.high %v1093_v26, %v1100_v27  ;;  %v1136_v39 = vcombine.high %v1112_v10, %v1127_v25  ;;  %v3947_v23 = vpop.f32.mrf.mxu1 }
 0x32f   : > { %v1178_v35 = vrot.slane %v1171_v29, %v4772_v13  ;;  %v1186_v36 = vrot.slane %v3740_v30, %v4772_v13  ;;  %v1151_v41 = vcombine.low %v1119_v14, %v1134_v33  ;;  %v1152_v42 = vcombine.high %v1119_v14, %v1134_v33 }
 0x330   : > { %v1143_v40 = vrot.slane %v1135_v34, %v4777_v18  ;;  %v1194_v43 = vrot.slane %v1187_v37, %v4772_v13  ;;  %v1202_v44 = vrot.slane %v3741_v38, %v4772_v13  ;;  %v1458_v47 = vrot.slane %v1451_v24, %v4777_v18  ;;  %v1025_v24 = vpop.f32.mrf.mxu1 }
 0x331   : > { %v1203_v45 = vcombine.low %v1178_v35, %v1186_v36  ;;  %v1150_v48 = vrot.slane %v1136_v39, %v4777_v18  ;;  %v1159_v49 = vrot.slane %v1151_v41, %v4777_v18  ;;  %v1166_v50 = vrot.slane %v1152_v42, %v4777_v18 }
 0x332   : > { %v1501_v51 = vcombine.low %v1484_v31, %v1492_v32  ;;  %v1211_v52 = vcombine.low %v1194_v43, %v1202_v44  ;;  %v1459_v53 = vcombine.low %v1450_v15, %v1458_v47  ;;  %v1493_v62 = vcombine.low %v1468_v22, %v1476_v7  ;;  %v3948_v22 = vpop.f32.mrf.mxu1 }
 0x333   : > { %v1221_v55 = vcombine.low %v1143_v40, %v1150_v48  ;;  %v3742_v59 = vcombine.high %v1143_v40, %v1150_v48  ;;  %v1237_v60 = vcombine.low %v1159_v49, %v1166_v50  ;;  %v3743_v61 = vcombine.high %v1159_v49, %v1166_v50 }
 0x334   : > { %v1210_v63 = vrot.slane %v1203_v45, %v4777_v18  ;;  %3950 = vmatpush3.xpose.msk.msra.mxu1 %vm1751_vm1, %v1459_v53  ;;  %v1218_v0 = vrot.slane %v1211_v52, %v4777_v18  ;;  %v1460_v8 = vcombine.high %v1450_v15, %v1458_v47  ;;  %v1508_v9 = vrot.slane %v1501_v51, %v4777_v18 }
 0x335   : > { %v1228_v1 = vrot.slane %v1221_v55, %v4772_v13  ;;  %v1236_v2 = vrot.slane %v3742_v59, %v4772_v13  ;;  %v1244_v3 = vrot.slane %v1237_v60, %v4772_v13  ;;  %v1252_v4 = vrot.slane %v3743_v61, %v4772_v13  ;;  %3954 = vmatprep.subr.mxu1 %v4379_v46 }
 0x336   : > { %v1219_v5 = vcombine.low %v1210_v63, %v1218_v0  ;;  %v1500_v11 = vrot.slane %v1493_v62, %v4777_v18  ;;  %v1220_v12 = vcombine.high %v1210_v63, %v1218_v0  ;;  %v812_v62 = vsub.s32 2, %v4744_v54 }
 0x337   : > { %v1261_v6 = vcombine.low %v1244_v3, %v1252_v4  ;;  %v1253_v10 = vcombine.low %v1228_v1, %v1236_v2 }
 0x338   : > { %3952 = vmatmul.mubr.msk.f32.vlgmr.msra.gmra.mxu1 %vm1751_vm1, %v1219_v5  ;;  %v1509_v16 = vcombine.low %v1500_v11, %v1508_v9  ;;  %v1510_v19 = vcombine.high %v1500_v11, %v1508_v9  ;;  %v813_v63 = vrot.slane %v4751_v58, %v812_v62 }
 0x339   : > { %3955 = vmatpush3.xpose.msk.msra.mxu1 %vm1751_vm1, %v1460_v8  ;;  %3956 = vmatprep.mubr.msk.f32.mxu1 %vm4381_vm0, %v4379_v46  ;;  %v1268_v14 = vrot.slane %v1261_v6, %v4777_v18  ;;  %v1260_v15 = vrot.slane %v1253_v10, %v4777_v18 }
 0x33a   : > { %3959 = vmatprep.subr.mxu1 %v4379_v46  ;;  %v1023_v0 = vadd.f32 %v1022_v21, %v813_v63  ;;  %v1026_v1 = vadd.f32 %v1025_v24, %v813_v63 }
 0x33b   : > { %v1269_v17 = vcombine.low %v1260_v15, %v1268_v14  ;;  %v1270_v20 = vcombine.high %v1260_v15, %v1268_v14 }
 0x33c   : > { %3957 = vmatmul.mubr.msk.f32.vlgmr.msra.gmra.mxu1 %vm1751_vm1, %v1220_v12  ;;  %v1519_v4 = vcombine.high %v1023_v0, %v4379_v46  ;;  %v1526_v8 = vrot.slane %v1023_v0, %v4772_v13 }
 0x33d   : > { %3960 = vmatpush3.xpose.msk.msra.mxu1 %vm1751_vm1, %v1509_v16  ;;  %3961 = vmatprep.mubr.msk.f32.mxu1 %vm4381_vm0, %v4379_v46 }
 0x33e   : > { %3964 = vmatprep.subr.mxu1 %v4379_v46  ;;  %v1533_v58 = vrot.slane %v1519_v4, %v4772_v13 }
 0x340   : > { %3962 = vmatmul.mubr.msk.f32.vlgmr.msra.gmra.mxu1 %vm1751_vm1, %v1269_v17 }
 0x341   : > { %3965 = vmatpush3.xpose.msk.msra.mxu1 %vm1751_vm1, %v1510_v19  ;;  %3966 = vmatprep.mubr.msk.f32.mxu1 %vm4381_vm0, %v4379_v46 }
 0x342   : > { %3969 = vmatprep.subr.mxu1 %v4379_v46 }
 0x344   : > { %3967 = vmatmul.mubr.msk.f32.vlgmr.msra.gmra.mxu1 %vm1751_vm1, %v1270_v20 }
 0x345   : > { %3971 = vmatprep.mubr.msk.f32.mxu1 %vm4381_vm0, %v4379_v46 }
 0x3f8   : > { %v1824_v7 = vpop.f32.mrf.mxu1 }
 0x3f9   : > { %v2057_v25 = vsel %vm2056_vm2, %v1824_v7, -inf }
 0x3fa   : > { %2058 = vmax.xlane.f32.xlu0 %v2057_v25  ;;  %v3953_v26 = vpop.f32.mrf.mxu1 }
 0x3fc   : > { %v1900_v27 = vpop.f32.mrf.mxu1 }
 0x3fd   : > { %v2060_v29 = vsel %vm2056_vm2, %v1900_v27, -inf }
 0x3fe   : > { %2061 = vmax.xlane.f32.xlu1 %v2060_v29  ;;  %v3958_v30 = vpop.f32.mrf.mxu1 }
 0x400   : > { %v1976_v31 = vpop.f32.mrf.mxu1 }
 0x401   : > { %v2063_v32 = vsel %vm2056_vm2, %v1976_v31, -inf }
 0x402   : > { %2064 = vmax.xlane.f32.xlu0 %v2063_v32  ;;  %v3963_v33 = vpop.f32.mrf.mxu1 }
 0x404   : > { %v2052_v34 = vpop.f32.mrf.mxu1 }
 0x405   : > { %v2066_v35 = vsel %vm2056_vm2, %v2052_v34, -inf }
 0x406   : > { %2067 = vmax.xlane.f32.xlu0 %v2066_v35  ;;  %v3968_v36 = vpop.f32.mrf.mxu1 }
 0x483   : > { %v2059_v37 = vpop.xlane.xlu0 %2058 }
 0x484   : > { %v2069_v38 = vsub.f32 %v1824_v7, %v2059_v37  ;;  %v1585_v7 = vcombine.high %v1026_v1, %v4379_v46 }
 0x486   : > { %v2073_v39 = vmul.f32 1.442695, %v2069_v38  ;;  %v1599_v37 = vrot.slane %v1585_v7, %v4772_v13 }
 0x487   : > { %v2062_v40 = vpop.xlane.xlu1 %2061 }
 0x488   : > { %4203 = vpow2.f32 %v2073_v39  ;;  %v2070_v41 = vsub.f32 %v1900_v27, %v2062_v40 }
 0x48a   : > { %v2075_v42 = vmul.f32 1.442695, %v2070_v41 }
 0x48b   : > { %v2065_v43 = vpop.xlane.xlu0 %2064 }
 0x48c   : > { %4205 = vpow2.f32 %v2075_v42  ;;  %v2071_v44 = vsub.f32 %v1976_v31, %v2065_v43  ;;  %v1592_v31 = vrot.slane %v1026_v1, %v4772_v13 }
 0x48e   : > { %v2077_v45 = vmul.f32 1.442695, %v2071_v44 }
 0x48f   : > { %v2068_v47 = vpop.xlane.xlu0 %2067 }
 0x490   : > { %4207 = vpow2.f32 %v2077_v45  ;;  %v2072_v48 = vsub.f32 %v2052_v34, %v2068_v47 }
 0x492   : > { %v2079_v49 = vmul.f32 1.442695, %v2072_v48 }
 0x494   : > { %4209 = vpow2.f32 %v2079_v49 }
 0x495   : > { %v4865_v50 = vpop.eup %4203 }
 0x496   : > { %v2081_v51 = vsel %vm2056_vm2, %v4865_v50, 0.0 }
 0x497   : > { %2082 = vadd.xlane.f32.xlu1 %v2081_v51 }
 0x499   : > { %v4869_v52 = vpop.eup %4205 }
 0x49a   : > { %v2084_v53 = vsel %vm2056_vm2, %v4869_v52, 0.0 }
 0x49b   : > { %2085 = vadd.xlane.f32.xlu0 %v2084_v53 }
 0x49d   : > { %v4873_v55 = vpop.eup %4207 }
 0x49e   : > { %v2087_v59 = vsel %vm2056_vm2, %v4873_v55, 0.0 }
 0x49f   : > { %2088 = vadd.xlane.f32.xlu1 %v2087_v59 }
 0x4a1   : > { %v4877_v60 = vpop.eup %4209 }
 0x4a2   : > { %v2090_v61 = vsel %vm2056_vm2, %v4877_v60, 0.0 }
 0x4a3   : > { %2091 = vadd.xlane.f32.xlu1 %v2090_v61 }
 0x4b1   : > { %1513 = vrot.lane.b32.xlu0 %v1023_v0, %s4380_s21 }
 0x4b4   : > { %1515 = vrot.lane.b32.xlu1 %v1026_v1, %s4380_s21 }
 0x520   : > { %v2083_v2 = vpop.xlane.xlu1 %2082 }
 0x521   : > { %4211 = vrcp.f32 %v2083_v2 }
 0x524   : > { %v2086_v3 = vpop.xlane.xlu0 %2085 }
 0x525   : > { %4213 = vrcp.f32 %v2086_v3 }
 0x528   : > { %v2089_v5 = vpop.xlane.xlu1 %2088  ;;  %v1514_v6 = vpop.permute.xlu0 %1513 }
 0x529   : > { %v1534_v9 = vcombine.high %v1514_v6, %v4379_v46  ;;  %v1541_v10 = vrot.slane %v1514_v6, %v4772_v13  ;;  %4215 = vrcp.f32 %v2089_v5 }
 0x52b   : > { %v1548_v11 = vrot.slane %v1534_v9, %v4772_v13  ;;  %v1549_v12 = vcombine.low %v1526_v8, %v1541_v10  ;;  %v1550_v14 = vcombine.high %v1526_v8, %v1541_v10 }
 0x52c   : > { %v2092_v16 = vpop.xlane.xlu1 %2091 }
 0x52d   : > { %v1557_v15 = vrot.slane %v1549_v12, %v4777_v18  ;;  %v1564_v17 = vrot.slane %v1550_v14, %v4777_v18  ;;  %v1565_v19 = vcombine.low %v1533_v58, %v1548_v11  ;;  %v1566_v20 = vcombine.high %v1533_v58, %v1548_v11 }
 0x52e   : > { %v4212_v42 = vpop.eup %4211  ;;  %4217 = vrcp.f32 %v2092_v16 }
 0x52f   : > { %v1573_v21 = vrot.slane %v1565_v19, %v4777_v18  ;;  %v1580_v23 = vrot.slane %v1566_v20, %v4777_v18  ;;  %v1651_v24 = vcombine.low %v1557_v15, %v1564_v17  ;;  %v3748_v22 = vcombine.high %v1557_v15, %v1564_v17  ;;  %v4116_v20 = vld [vmem:[%s4649_s27 + $0x30] sm:$0xff]  }
 0x530   : > { %v1516_v25 = vpop.permute.xlu1 %1515  ;;  %v2097_v0 = vmul.f32 %v4212_v42, %v4865_v50 }
 0x531   : > { %v1658_v26 = vrot.slane %v1651_v24, %v4772_v13  ;;  %v1666_v27 = vrot.slane %v3748_v22, %v4772_v13  ;;  %v1667_v29 = vcombine.low %v1573_v21, %v1580_v23  ;;  %v3749_v30 = vcombine.high %v1573_v21, %v1580_v23  ;;  %v4117_v21 = vld [vmem:[%s4649_s27 + $0x28] sm:$0xff]   ;;  %v4118_v23 = vld [vmem:[%s4649_s27 + $0x20] sm:$0xff]   ;;  %v4120_v24 = vld [vmem:[%s4649_s27 + $0x10] sm:$0xff]  }
 0x532   : > { %v1600_v32 = vcombine.high %v1516_v25, %v4379_v46  ;;  %v1607_v33 = vrot.slane %v1516_v25, %v4772_v13  ;;  %v4214_v5 = vpop.eup %4213  ;;  %v4121_v22 = vld [vmem:[%s4649_s27 + $0x8] sm:$0xff]  }
 0x533   : > { %v1674_v34 = vrot.slane %v1667_v29, %v4772_v13  ;;  %v1682_v35 = vrot.slane %v3749_v30, %v4772_v13  ;;  %v1683_v36 = vcombine.low %v1658_v26, %v1666_v27  ;;  %v2098_v50 = vmul.f32 %v4214_v5, %v4869_v52 }
 0x534   : > { %v1614_v38 = vrot.slane %v1600_v32, %v4772_v13  ;;  %v1615_v39 = vcombine.low %v1592_v31, %v1607_v33  ;;  %v1616_v40 = vcombine.high %v1592_v31, %v1607_v33 }
 0x535   : > { %v1691_v41 = vcombine.low %v1674_v34, %v1682_v35  ;;  %v1690_v48 = vrot.slane %v1683_v36, %v4777_v18 }
 0x536   : > { %v1623_v43 = vrot.slane %v1615_v39, %v4777_v18  ;;  %v1630_v44 = vrot.slane %v1616_v40, %v4777_v18  ;;  %v1631_v45 = vcombine.low %v1599_v37, %v1614_v38  ;;  %v1632_v47 = vcombine.high %v1599_v37, %v1614_v38  ;;  %v4216_v11 = vpop.eup %4215 }
 0x537   : > { %v1698_v49 = vrot.slane %v1691_v41, %v4777_v18  ;;  %v2099_v15 = vmul.f32 %v4216_v11, %v4873_v55  ;;  %v4115_v55 = vld [vmem:[%s4649_s27 + $0x38] sm:$0xff]  }
 0x538   : > { %v1639_v51 = vrot.slane %v1631_v45, %v4777_v18  ;;  %v1646_v53 = vrot.slane %v1632_v47, %v4777_v18  ;;  %v1701_v59 = vcombine.low %v1623_v43, %v1630_v44  ;;  %v3750_v61 = vcombine.high %v1623_v43, %v1630_v44  ;;  %3990 = vmatpush3.bf16.msra.mxu0 %v4115_v55 }
 0x539   : > { %v1699_v63 = vcombine.low %v1690_v48, %v1698_v49  ;;  %v1700_v6 = vcombine.high %v1690_v48, %v1698_v49  ;;  %3991 = vmatprep.subr.bf16.mxu0 %v4379_v46 }
 0x53a   : > { %v1708_v1 = vrot.slane %v1701_v59, %v4772_v13  ;;  %v1716_v2 = vrot.slane %v3750_v61, %v4772_v13  ;;  %v1717_v3 = vcombine.low %v1639_v51, %v1646_v53  ;;  %v3751_v4 = vcombine.high %v1639_v51, %v1646_v53 }
 0x53b   : > { %3970 = vmatpush3.msra.mxu1 %v1699_v63  ;;  %v4218_v52 = vpop.eup %4217 }
 0x53c   : > { %v1724_v8 = vrot.slane %v1717_v3, %v4772_v13  ;;  %v1732_v9 = vrot.slane %v3751_v4, %v4772_v13  ;;  %3972 = vmatmul.mubr.msk.f32.vlgmr.msra.gmra.mxu1 %vm2056_vm2, %v2097_v0  ;;  %3974 = vmatprep.subr.mxu1 %v4379_v46  ;;  %v1733_v10 = vcombine.low %v1708_v1, %v1716_v2 }
 0x53d   : > { %3975 = vmatpush3.msra.mxu1 %v1700_v6  ;;  %3976 = vmatprep.mubr.msk.f32.mxu1 %vm4381_vm0, %v4379_v46  ;;  %v2100_v19 = vmul.f32 %v4218_v52, %v4877_v60  ;;  %v4119_v60 = vld [vmem:[%s4649_s27 + $0x18] sm:$0xff]  }
 0x53e   : > { %3979 = vmatprep.subr.mxu1 %v4379_v46  ;;  %v1741_v58 = vcombine.low %v1724_v8, %v1732_v9  ;;  %v1740_v12 = vrot.slane %v1733_v10, %v4777_v18  ;;  %3992 = vmatpush3.bf16.msra.mxu0 %v4116_v20 }
 0x53f   : > { %3993 = vmatprep.subr.bf16.mxu0 %v4379_v46 }
 0x540   : > { %3977 = vmatmul.mubr.msk.f32.vlgmr.msra.gmra.mxu1 %vm2056_vm2, %v2098_v50  ;;  %v1748_v14 = vrot.slane %v1741_v58, %v4777_v18 }
 0x541   : > { %3981 = vmatprep.mubr.msk.f32.mxu1 %vm4381_vm0, %v4379_v46 }
 0x542   : > { %v1749_v16 = vcombine.low %v1740_v12, %v1748_v14  ;;  %v1750_v17 = vcombine.high %v1740_v12, %v1748_v14  ;;  %3994 = vmatpush3.bf16.msra.mxu0 %v4117_v21 }
 0x543   : > { %3995 = vmatprep.subr.bf16.mxu0 %v4379_v46 }
 0x544   : > { %3980 = vmatpush3.msra.mxu1 %v1749_v16 }
 0x545   : > { %3982 = vmatmul.mubr.msk.f32.vlgmr.msra.gmra.mxu1 %vm2056_vm2, %v2099_v15  ;;  %3984 = vmatprep.subr.mxu1 %v4379_v46 }
 0x546   : > { %3985 = vmatpush3.msra.mxu1 %v1750_v17  ;;  %3986 = vmatprep.mubr.msk.f32.mxu1 %vm4381_vm0, %v4379_v46 }
 0x547   : > { %3996 = vmatpush3.bf16.msra.mxu0 %v4118_v23 }
 0x548   : > { %3997 = vmatprep.subr.bf16.mxu0 %v4379_v46 }
 0x549   : > { %3987 = vmatmul.mubr.msk.f32.vlgmr.msra.gmra.mxu1 %vm2056_vm2, %v2100_v19 }
 0x54a   : > { %3038 = vmatprep.mubr.bf16.mxu1 %v4378_v28 }
 0x54b   : > { %3998 = vmatpush3.bf16.msra.mxu0 %v4119_v60 }
 0x54c   : > { %3999 = vmatprep.subr.bf16.mxu0 %v4379_v46 }
 0x54f   : > { %4000 = vmatpush3.bf16.msra.mxu0 %v4120_v24  ;;  %v4122_v24 = vld [vmem:[%s4649_s27] sm:$0xff]  }
 0x550   : > { %4001 = vmatprep.subr.bf16.mxu0 %v4379_v46 }
 0x553   : > { %4002 = vmatpush3.bf16.msra.mxu0 %v4121_v22 }
 0x554   : > { %4003 = vmatprep.subr.bf16.mxu0 %v4379_v46 }
 0x557   : > { %4004 = vmatpush3.bf16.msra.mxu0 %v4122_v24  ;;  %v4161_v24 = vld [vmem:[%s4634_s20 + $0x24] ss:$16 sps:$4 sm:$0xff]  }
 0x5fc   : > { %v2170_v7 = vpop.f32.mrf.mxu1 }
 0x5fd   : > { %v2393_v26 = vcombine.high %v2170_v7, %v4379_v46  ;;  %v2400_v29 = vrot.slane %v2170_v7, %v4772_v13 }
 0x5fe   : > { %v3973_v25 = vpop.f32.mrf.mxu1 }
 0x5ff   : > { %v2407_v33 = vrot.slane %v2393_v26, %v4772_v13 }
 0x600   : > { %v2243_v27 = vpop.f32.mrf.mxu1 }
 0x601   : > { %v2408_v30 = vcombine.high %v2243_v27, %v4379_v46  ;;  %v2415_v31 = vrot.slane %v2243_v27, %v4772_v13 }
 0x602   : > { %v3978_v32 = vpop.f32.mrf.mxu1 }
 0x603   : > { %v2422_v34 = vrot.slane %v2408_v30, %v4772_v13  ;;  %v2423_v35 = vcombine.low %v2400_v29, %v2415_v31  ;;  %v2424_v36 = vcombine.high %v2400_v29, %v2415_v31 }
 0x605   : > { %v2431_v37 = vrot.slane %v2423_v35, %v4777_v18  ;;  %v2438_v38 = vrot.slane %v2424_v36, %v4777_v18  ;;  %v2439_v39 = vcombine.low %v2407_v33, %v2422_v34  ;;  %v2440_v40 = vcombine.high %v2407_v33, %v2422_v34  ;;  %v2316_v41 = vpop.f32.mrf.mxu1 }
 0x606   : > { %v2459_v48 = vcombine.high %v2316_v41, %v4379_v46  ;;  %v2466_v63 = vrot.slane %v2316_v41, %v4772_v13 }
 0x607   : > { %v2447_v42 = vrot.slane %v2439_v39, %v4777_v18  ;;  %v2454_v43 = vrot.slane %v2440_v40, %v4777_v18  ;;  %v2525_v44 = vcombine.low %v2431_v37, %v2438_v38  ;;  %v3764_v45 = vcombine.high %v2431_v37, %v2438_v38  ;;  %v3983_v47 = vpop.f32.mrf.mxu1 }
 0x608   : > { %v2473_v6 = vrot.slane %v2459_v48, %v4772_v13 }
 0x609   : > { %v2532_v49 = vrot.slane %v2525_v44, %v4772_v13  ;;  %v2540_v51 = vrot.slane %v3764_v45, %v4772_v13  ;;  %v2541_v53 = vcombine.low %v2447_v42, %v2454_v43  ;;  %v3765_v59 = vcombine.high %v2447_v42, %v2454_v43  ;;  %v2389_v61 = vpop.f32.mrf.mxu1  ;;  %v4243_v42 = vld [vmem:[%s5191_s22] sm:$0xff] }
 0x60a   : > { %v2474_v0 = vcombine.high %v2389_v61, %v4379_v46  ;;  %v2481_v1 = vrot.slane %v2389_v61, %v4772_v13 }
 0x60b   : > { %v2548_v2 = vrot.slane %v2541_v53, %v4772_v13  ;;  %v2556_v3 = vrot.slane %v3765_v59, %v4772_v13  ;;  %v3988_v4 = vpop.f32.mrf.mxu1  ;;  %v2557_v5 = vcombine.low %v2532_v49, %v2540_v51  ;;  %v4123_v49 = vld [vmem:[%s4634_s20 + $0xe0] ss:$16 sps:$4 sm:$0xff]   ;;  %v4125_v51 = vld [vmem:[%s4634_s20 + $0xe4] ss:$16 sps:$4 sm:$0xff]   ;;  %v4126_v53 = vld [vmem:[%s4634_s20 + $0xe8] ss:$16 sps:$4 sm:$0xff]  }
 0x60c   : > { %v2488_v8 = vrot.slane %v2474_v0, %v4772_v13  ;;  %v2489_v9 = vcombine.low %v2466_v63, %v2481_v1  ;;  %v2490_v10 = vcombine.high %v2466_v63, %v2481_v1  ;;  %v4128_v59 = vld [vmem:[%s4634_s20 + $0xec] ss:$16 sps:$4 sm:$0xff]   ;;  %3006 = vmatprep.subr.bf16.mxu1 %v4125_v51  ;;  %v4175_v51 = vld [vmem:[%s4686_s23 + $0x70] sm:$0xff]  }
 0x60d   : > { %v2565_v50 = vcombine.low %v2548_v2, %v2556_v3  ;;  %v2564_v14 = vrot.slane %v2557_v5, %v4777_v18  ;;  %3049 = vmatprep.subr.bf16.mxu0 %v4128_v59  ;;  %3007 = vmatpush1.bf16.msra.mxu1 %v4123_v49  ;;  %v4174_v49 = vld [vmem:[%s4686_s23 + $0xb8] sm:$0xff]   ;;  %v4177_v59 = vld [vmem:[%s4686_s23 + $0x30] sm:$0xff]  }
 0x60e   : > { %v2497_v58 = vrot.slane %v2489_v9, %v4777_v18  ;;  %v2504_v46 = vrot.slane %v2490_v10, %v4777_v18  ;;  %v2505_v11 = vcombine.low %v2473_v6, %v2488_v8  ;;  %v2506_v12 = vcombine.high %v2473_v6, %v2488_v8  ;;  %v4131_v6 = vld [vmem:[%s4634_s20 + $0xc4] ss:$16 sps:$4 sm:$0xff]   ;;  %v4134_v8 = vld [vmem:[%s4634_s20 + $0xcc] ss:$16 sps:$4 sm:$0xff]   ;;  %v4129_v9 = vld [vmem:[%s4634_s20 + $0xc0] ss:$16 sps:$4 sm:$0xff]  }
 0x60f   : > { %v2572_v16 = vrot.slane %v2565_v50, %v4777_v18  ;;  %v4132_v10 = vld [vmem:[%s4634_s20 + $0xc8] ss:$16 sps:$4 sm:$0xff]   ;;  %3008 = vmatprep.subr.bf16.mxu1 %v4131_v6  ;;  %v4137_v50 = vld [vmem:[%s4634_s20 + $0xa4] ss:$16 sps:$4 sm:$0xff]  }
 0x610   : > { %v2513_v15 = vrot.slane %v2505_v11, %v4777_v18  ;;  %v2520_v52 = vrot.slane %v2506_v12, %v4777_v18  ;;  %v2575_v17 = vcombine.low %v2497_v58, %v2504_v46  ;;  %v3766_v19 = vcombine.high %v2497_v58, %v2504_v46  ;;  %v4140_v58 = vld [vmem:[%s4634_s20 + $0xac] ss:$16 sps:$4 sm:$0xff]   ;;  %v4135_v46 = vld [vmem:[%s4634_s20 + $0xa0] ss:$16 sps:$4 sm:$0xff]   ;;  %v4138_v11 = vld [vmem:[%s4634_s20 + $0xa8] ss:$16 sps:$4 sm:$0xff]  }
 0x611   : > { %v2573_v55 = vcombine.low %v2564_v14, %v2572_v16  ;;  %v2574_v30 = vcombine.high %v2564_v14, %v2572_v16  ;;  %3009 = vmatpush1.bf16.msra.mxu1 %v4129_v9  ;;  %v4143_v12 = vld [vmem:[%s4634_s20 + $0x84] ss:$16 sps:$4 sm:$0xff]   ;;  %v4141_v14 = vld [vmem:[%s4634_s20 + $0x80] ss:$16 sps:$4 sm:$0xff]   ;;  %v4144_v16 = vld [vmem:[%s4634_s20 + $0x88] ss:$16 sps:$4 sm:$0xff]  }
 0x612   : > { %v2582_v20 = vrot.slane %v2575_v17, %v4772_v13  ;;  %v2590_v21 = vrot.slane %v3766_v19, %v4772_v13  ;;  %v2591_v23 = vcombine.low %v2513_v15, %v2520_v52  ;;  %v3767_v60 = vcombine.high %v2513_v15, %v2520_v52  ;;  %3010 = vmatprep.subr.bf16.mxu1 %v4137_v50  ;;  %v4146_v15 = vld [vmem:[%s4634_s20 + $0x8c] ss:$16 sps:$4 sm:$0xff]   ;;  %v4149_v52 = vld [vmem:[%s4634_s20 + $0x64] ss:$16 sps:$4 sm:$0xff]   ;;  %v4147_v19 = vld [vmem:[%s4634_s20 + $0x60] ss:$16 sps:$4 sm:$0xff]  }
 0x613   : > { %v4152_v17 = vld [vmem:[%s4634_s20 + $0x6c] ss:$16 sps:$4 sm:$0xff]   ;;  %v4186_v6 = vld [vmem:[%s4686_s23 + $0xa0] sm:$0xff]  }
 0x614   : > { %v2598_v22 = vrot.slane %v2591_v23, %v4772_v13  ;;  %v2606_v7 = vrot.slane %v3767_v60, %v4772_v13  ;;  %v2607_v25 = vcombine.low %v2582_v20, %v2590_v21  ;;  %v4155_v20 = vld [vmem:[%s4634_s20 + $0x44] ss:$16 sps:$4 sm:$0xff]   ;;  %v4158_v21 = vld [vmem:[%s4634_s20 + $0x4c] ss:$16 sps:$4 sm:$0xff]   ;;  %v4153_v23 = vld [vmem:[%s4634_s20 + $0x40] ss:$16 sps:$4 sm:$0xff]  }
 0x615   : > { %3011 = vmatpush1.bf16.msra.mxu1 %v4135_v46  ;;  %v4156_v60 = vld [vmem:[%s4634_s20 + $0x48] ss:$16 sps:$4 sm:$0xff]   ;;  %v4192_v46 = vld [vmem:[%s4686_s23 + $0xd0] sm:$0xff]  }
 0x616   : > { %v2615_v26 = vcombine.low %v2598_v22, %v2606_v7  ;;  %v2614_v27 = vrot.slane %v2607_v25, %v4777_v18  ;;  %3012 = vmatprep.subr.bf16.mxu1 %v4143_v12  ;;  %v4164_v22 = vld [vmem:[%s4634_s20 + $0x2c] ss:$16 sps:$4 sm:$0xff]   ;;  %v4159_v7 = vld [vmem:[%s4634_s20 + $0x20] ss:$16 sps:$4 sm:$0xff]   ;;  %v4162_v25 = vld [vmem:[%s4634_s20 + $0x28] ss:$16 sps:$4 sm:$0xff]  }
 0x617   : > { %v4188_v9 = vld [vmem:[%s4686_s23 + $0xd8] sm:$0xff]   ;;  %v4194_v12 = vld [vmem:[%s4686_s23 + $0x90] sm:$0xff]  }
 0x618   : > { %v2622_v29 = vrot.slane %v2615_v26, %v4777_v18  ;;  %v3768_v18 = vld [vmem:[%s5192_s13] ss:$0 sm:$0xff]  ;;  %v4167_v26 = vld [vmem:[%s4634_s20 + $0x4] ss:$16 sps:$4 sm:$0xff]   ;;  %v4190_v50 = vld [vmem:[%s4686_s23 + $0x98] sm:$0xff]  }
 0x619   : > { %3013 = vmatpush1.bf16.msra.mxu1 %v4141_v14  ;;  %v4195_v14 = vld [vmem:[%s4686_s23 + $0x48] sm:$0xff]  }
 0x61a   : > { %v2624_v31 = vcombine.high %v2614_v27, %v2622_v29  ;;  %v2623_v32 = vcombine.low %v2614_v27, %v2622_v29  ;;  %3014 = vmatprep.subr.bf16.mxu1 %v4149_v52  ;;  %v4170_v27 = vld [vmem:[%s4634_s20 + $0xc] ss:$16 sps:$4 sm:$0xff]   ;;  %v4165_v29 = vld [vmem:[%s4634_s20] ss:$16 sps:$4 sm:$0xff]  }
 0x61b   : > { %v4198_v52 = vld [vmem:[%s4686_s23 + $0x88] sm:$0xff]  }
 0x61c   : > { %v4078_v33 = vpack.i.bf16 %v2624_v31, %v2574_v30  ;;  %v4168_v30 = vld [vmem:[%s4634_s20 + $0x8] ss:$16 sps:$4 sm:$0xff]  }
 0x61d   : > { %3015 = vmatpush1.bf16.msra.mxu1 %v4147_v19  ;;  %v4200_v19 = vld [vmem:[%s4686_s23 + $0xc0] sm:$0xff]  }
 0x61e   : > { %4079 = vrot.lane.b32.xlu0 %v4078_v33, %s4380_s21  ;;  %3016 = vmatprep.subr.bf16.mxu1 %v4155_v20  ;;  %v4202_v20 = vld [vmem:[%s4686_s23 + $0x80] sm:$0xff]  }
 0x621   : > { %3017 = vmatpush1.bf16.msra.mxu1 %v4153_v23  ;;  %v2840_v23 = vsub.s32 3, %v4744_v54 }
 0x622   : > { %3018 = vmatprep.subr.bf16.mxu1 %v4161_v24 }
 0x625   : > { %3019 = vmatpush1.bf16.msra.mxu1 %v4159_v7 }
 0x626   : > { %3020 = vmatprep.subr.bf16.mxu1 %v4167_v26 }
 0x629   : > { %3021 = vmatpush1.bf16.msra.mxu1 %v4165_v29 }
 0x690   : > { %v4080_v34 = vpop.permute.xlu0 %4079 }
 0x691   : > { %v4082_v35 = vunpack.i.h.bf16 %v4080_v34  ;;  %v4081_v36 = vunpack.i.l.bf16 %v4080_v34 }
 0x693   : > { %v2633_v37 = vsel %vm1751_vm1, %v2573_v55, %v4081_v36  ;;  %v2634_v13 = vsel %vm1751_vm1, %v2623_v32, %v4082_v35  ;;  %v4150_v55 = vld [vmem:[%s4634_s20 + $0x68] ss:$16 sps:$4 sm:$0xff]  }
 0x694   : > { %v2635_v38 = vpack.c.bf16 %v2634_v13, %v2633_v37 }
 0x696   : > { %4006 = vmatmul.mubr.bf16.vlgmr.msra.gmra.mxu0 %v2635_v38  ;;  %v3777_v38 = vld [vmem:[%s5193_s9] ss:$0 sm:$0xff] }
 0x697   : > { %3081 = vmatprep.mubr.bf16.mxu0 %v4378_v28  ;;  %v4244_v28 = vld [vmem:[%s5191_s22 + $0x8] sm:$0xff]  ;;  %3050 = vmatpush1.bf16.msra.mxu0 %v4126_v53  ;;  %v4176_v53 = vld [vmem:[%s4686_s23 + $0xf0] sm:$0xff]  }
 0x698   : > { %3051 = vmatprep.subr.bf16.mxu0 %v4134_v8  ;;  %v4187_v8 = vld [vmem:[%s4686_s23 + $0x58] sm:$0xff]  }
 0x69b   : > { %3052 = vmatpush1.bf16.msra.mxu0 %v4132_v10  ;;  %v4189_v10 = vld [vmem:[%s4686_s23 + $0x18] sm:$0xff]  }
 0x69c   : > { %3053 = vmatprep.subr.bf16.mxu0 %v4140_v58  ;;  %v4191_v58 = vld [vmem:[%s4686_s23 + $0x50] sm:$0xff]  }
 0x69f   : > { %3054 = vmatpush1.bf16.msra.mxu0 %v4138_v11  ;;  %v4193_v11 = vld [vmem:[%s4686_s23 + $0x10] sm:$0xff]  }
 0x6a0   : > { %3055 = vmatprep.subr.bf16.mxu0 %v4146_v15  ;;  %v4197_v15 = vld [vmem:[%s4686_s23 + $0x8] sm:$0xff]  }
 0x6a3   : > { %3056 = vmatpush1.bf16.msra.mxu0 %v4144_v16  ;;  %v4196_v16 = vld [vmem:[%s4686_s23 + $0xc8] sm:$0xff]  }
 0x6a4   : > { %3057 = vmatprep.subr.bf16.mxu0 %v4152_v17  ;;  %v4199_v17 = vld [vmem:[%s4686_s23 + $0x40] sm:$0xff]  }
 0x6a7   : > { %3058 = vmatpush1.bf16.msra.mxu0 %v4150_v55  ;;  %v4201_v55 = vld [vmem:[%s4686_s23] sm:$0xff]  }
 0x6a8   : > { %3059 = vmatprep.subr.bf16.mxu0 %v4158_v21  ;;  %v2824_v21 = vld [vmem:[%s4672_s5] sm:$0xf] }
 0x6a9   : > { %v2837_v24 = vrot.slane %v2824_v21, %v812_v62  ;;  %v2841_v26 = vrot.slane %v2824_v21, %v2840_v23 }
 0x6ab   : > { %3060 = vmatpush1.bf16.msra.mxu0 %v4156_v60  ;;  %v2829_v60 = vrot.slane %v2824_v21, %v804_v56 }
 0x6ac   : > { %3061 = vmatprep.subr.bf16.mxu0 %v4164_v22 }
 0x6af   : > { %3062 = vmatpush1.bf16.msra.mxu0 %v4162_v25  ;;  %v2833_v25 = vrot.slane %v2824_v21, %v808_v57 }
 0x6b0   : > { %3063 = vmatprep.subr.bf16.mxu0 %v4170_v27 }
 0x6b3   : > { %3064 = vmatpush1.bf16.msra.mxu0 %v4168_v30 }
 0x756   : > { %v2741_v39 = vpop.f32.mrf.mxu0 }
 0x757   : > { %v2742_v40 = vadd.f32 %v3768_v18, %v2741_v39 }
 0x758   : > { %v4007_v41 = vpop.f32.mrf.mxu0 }
 0x759   : > { %v2748_v43 = vadd.f32 %v4243_v42, %v2742_v40  ;;  %v3778_v41 = vld [vmem:[%s701_s3] ss:$0 sm:$0xff] }
 0x75a   : > { %v2744_v44 = vpop.f32.mrf.mxu0 }
 0x75b   : > { %v2745_v45 = vadd.f32 %v3768_v18, %v2744_v44  ;;  %2752 = vadd.xlane.f32.xlu1 %v2748_v43 }
 0x75c   : > { %v4008_v47 = vpop.f32.mrf.mxu0 }
 0x75d   : > { %v2749_v48 = vadd.f32 %v4244_v28, %v2745_v45  ;;  %v4171_v47 = vld [vmem:[%s4686_s23 + $0x78] sm:$0xff]  }
 0x75e   : > { %v4172_v28 = vld [vmem:[%s4686_s23 + $0xf8] sm:$0xff]   ;;  %3885 = vmatprep.subr.bf16.mxu1 %v4171_v47 }
 0x75f   : > { %2754 = vadd.xlane.f32.xlu0 %v2749_v48  ;;  %3907 = vmatprep.subr.bf16.mxu0 %v4172_v28 }
 0x7e4   : > { %v2753_v61 = vpop.xlane.xlu1 %2752 }
 0x7e5   : > { %v2757_v63 = vmul.f32 0.0078125, %v2753_v61  ;;  %v4178_v61 = vld [vmem:[%s4686_s23 + $0xb0] sm:$0xff]  }
 0x7e7   : > { %v5003_v0 = vsub.f32 %v2748_v43, %v2757_v63  ;;  %v4179_v63 = vld [vmem:[%s4686_s23 + $0x68] sm:$0xff]  }
 0x7e8   : > { %v2755_v1 = vpop.xlane.xlu0 %2754 }
 0x7e9   : > { %v2758_v2 = vmul.f32 0.0078125, %v2755_v1  ;;  %v2761_v3 = vmul.f32 %v5003_v0, %v5003_v0  ;;  %v4181_v1 = vld [vmem:[%s4686_s23 + $0x28] sm:$0xff]  }
 0x7eb   : > { %v5007_v4 = vsub.f32 %v2749_v48, %v2758_v2  ;;  %2763 = vadd.xlane.f32.xlu0 %v2761_v3  ;;  %v4173_v48 = vld [vmem:[%s4686_s23 + $0x38] sm:$0xff]   ;;  %v4182_v2 = vld [vmem:[%s4686_s23 + $0xa8] sm:$0xff]   ;;  %v4183_v3 = vld [vmem:[%s4686_s23 + $0x60] sm:$0xff]  }
 0x7ed   : > { %v2762_v5 = vmul.f32 %v5007_v4, %v5007_v4 }
 0x7ef   : > { %2765 = vadd.xlane.f32.xlu1 %v2762_v5  ;;  %v4185_v5 = vld [vmem:[%s4686_s23 + $0x20] sm:$0xff]  }
 0x874   : > { %v2764_v31 = vpop.xlane.xlu0 %2763 }
 0x875   : > { %v2767_v32 = vmul.f32 0.0078125, %v2764_v31 }
 0x877   : > { %v2769_v33 = vadd.f32 1e-12, %v2767_v32 }
 0x878   : > { %v2766_v34 = vpop.xlane.xlu1 %2765 }
 0x879   : > { %4219 = vrsqrt.f32 %v2769_v33  ;;  %v2768_v35 = vmul.f32 0.0078125, %v2766_v34 }
 0x87b   : > { %v2770_v36 = vadd.f32 1e-12, %v2768_v35 }
 0x87d   : > { %4221 = vrsqrt.f32 %v2770_v36 }
 0x886   : > { %v4220_v37 = vpop.eup %4219 }
 0x887   : > { %v2773_v13 = vmul.f32 %v4220_v37, %v5003_v0  ;;  %v4180_v0 = vld [vmem:[%s4686_s23 + $0xe8] sm:$0xff]  }
 0x889   : > { %v2781_v40 = vmul.f32 %v3777_v38, %v2773_v13 }
 0x88a   : > { %v4222_v18 = vpop.eup %4221 }
 0x88b   : > { %v2774_v39 = vmul.f32 %v4222_v18, %v5007_v4  ;;  %v5051_v43 = vadd.f32 %v3778_v41, %v2781_v40  ;;  %v4184_v4 = vld [vmem:[%s4686_s23 + $0xe0] sm:$0xff]  }
 0x88d   : > { %v2782_v42 = vmul.f32 %v3777_v38, %v2774_v39 }
 0x88f   : > { %v5053_v44 = vadd.f32 %v3778_v41, %v2782_v42 }
 0x891   : > { %v2791_v45 = vpack.c.bf16 %v5053_v44, %v5051_v43 }
 0x893   : > { %3039 = vmatmul.mubr.bf16.vlgmr.msra.gmra.mxu1 %v2791_v45  ;;  %3082 = vmatmul.mubr.bf16.vlgmr.msra.gmra.mxu0 %v2791_v45 }
 0x894   : > { %3886 = vmatpush3.bf16.msra.mxu1 %v4173_v48  ;;  %3908 = vmatpush3.bf16.msra.mxu0 %v4174_v49 }
 0x895   : > { %3887 = vmatprep.subr.bf16.mxu1 %v4175_v51  ;;  %3909 = vmatprep.subr.bf16.mxu0 %v4176_v53 }
 0x898   : > { %3888 = vmatpush3.bf16.msra.mxu1 %v4177_v59  ;;  %3910 = vmatpush3.bf16.msra.mxu0 %v4178_v61 }
 0x899   : > { %3889 = vmatprep.subr.bf16.mxu1 %v4179_v63  ;;  %3911 = vmatprep.subr.bf16.mxu0 %v4180_v0 }
 0x89c   : > { %3890 = vmatpush3.bf16.msra.mxu1 %v4181_v1  ;;  %3912 = vmatpush3.bf16.msra.mxu0 %v4182_v2 }
 0x89d   : > { %3891 = vmatprep.subr.bf16.mxu1 %v4183_v3  ;;  %3913 = vmatprep.subr.bf16.mxu0 %v4184_v4 }
 0x8a0   : > { %3892 = vmatpush3.bf16.msra.mxu1 %v4185_v5  ;;  %3914 = vmatpush3.bf16.msra.mxu0 %v4186_v6 }
 0x8a1   : > { %3893 = vmatprep.subr.bf16.mxu1 %v4187_v8  ;;  %3915 = vmatprep.subr.bf16.mxu0 %v4188_v9 }
 0x8a4   : > { %3894 = vmatpush3.bf16.msra.mxu1 %v4189_v10  ;;  %3916 = vmatpush3.bf16.msra.mxu0 %v4190_v50 }
 0x8a5   : > { %3895 = vmatprep.subr.bf16.mxu1 %v4191_v58  ;;  %3917 = vmatprep.subr.bf16.mxu0 %v4192_v46 }
 0x8a8   : > { %3896 = vmatpush3.bf16.msra.mxu1 %v4193_v11  ;;  %3918 = vmatpush3.bf16.msra.mxu0 %v4194_v12 }
 0x8a9   : > { %3897 = vmatprep.subr.bf16.mxu1 %v4195_v14  ;;  %3919 = vmatprep.subr.bf16.mxu0 %v4196_v16 }
 0x8ac   : > { %3898 = vmatpush3.bf16.msra.mxu1 %v4197_v15  ;;  %3920 = vmatpush3.bf16.msra.mxu0 %v4198_v52 }
 0x8ad   : > { %3899 = vmatprep.subr.bf16.mxu1 %v4199_v17  ;;  %3921 = vmatprep.subr.bf16.mxu0 %v4200_v19 }
 0x8b0   : > { %3900 = vmatpush3.bf16.msra.mxu1 %v4201_v55  ;;  %3922 = vmatpush3.bf16.msra.mxu0 %v4202_v20 }
 0x953   : > { %v3040_v22 = vpop.f32.mrf.mxu1  ;;  %v3083_v7 = vpop.f32.mrf.mxu0 }
 0x954   : > { %v3041_v27 = vadd.f32 %v3040_v22, %v2829_v60  ;;  %v3084_v29 = vadd.f32 %v3083_v7, %v2837_v24 }
 0x955   : > { %v3042_v30 = vpop.f32.mrf.mxu1  ;;  %v3085_v31 = vpop.f32.mrf.mxu0 }
 0x956   : > { %v3100_v32 = vmul.f32 0.70710677, %v3041_v27  ;;  %v3102_v33 = vmul.f32 0.70710677, %v3084_v29  ;;  %v3043_v34 = vadd.f32 %v3042_v30, %v2833_v25  ;;  %v3086_v35 = vadd.f32 %v3085_v31, %v2841_v26 }
 0x957   : > { %v3044_v36 = vpop.f32.mrf.mxu1  ;;  %v3087_v37 = vpop.f32.mrf.mxu0  ;;  %v3092_v59 = vmul.f32 0.5, %v3041_v27  ;;  %v3094_v14 = vmul.f32 0.5, %v3084_v29 }
 0x958   : > { %v3045_v56 = vadd.f32 %v3044_v36, %v2829_v60  ;;  %v3088_v13 = vadd.f32 %v3087_v37, %v2837_v24  ;;  %4223 = verf.f32 %v3100_v32  ;;  %v3101_v62 = vmul.f32 0.70710677, %v3043_v34 }
 0x959   : > { %v3046_v38 = vpop.f32.mrf.mxu1  ;;  %v3089_v18 = vpop.f32.mrf.mxu0  ;;  %4225 = verf.f32 %v3102_v33  ;;  %v3103_v54 = vmul.f32 0.70710677, %v3086_v35  ;;  %v3093_v61 = vmul.f32 0.5, %v3043_v34  ;;  %v3095_v58 = vmul.f32 0.5, %v3086_v35 }
 0x95a   : > { %v3104_v57 = vmul.f32 0.70710677, %v3045_v56  ;;  %4227 = verf.f32 %v3101_v62  ;;  %v3106_v39 = vmul.f32 0.70710677, %v3088_v13  ;;  %v3047_v40 = vadd.f32 %v3046_v38, %v2833_v25  ;;  %v3811_v25 = vld [vmem:[%s708_s25] ss:$0 sm:$0xff] }
 0x95b   : > { %v3090_v41 = vadd.f32 %v3089_v18, %v2841_v26  ;;  %4229 = verf.f32 %v3103_v54  ;;  %v3096_v4 = vmul.f32 0.5, %v3045_v56  ;;  %v3098_v9 = vmul.f32 0.5, %v3088_v13 }
 0x95c   : > { %4231 = verf.f32 %v3104_v57  ;;  %v3105_v42 = vmul.f32 0.70710677, %v3047_v40  ;;  %v3097_v10 = vmul.f32 0.5, %v3047_v40 }
 0x95d   : > { %4233 = verf.f32 %v3106_v39  ;;  %v3107_v45 = vmul.f32 0.70710677, %v3090_v41  ;;  %v3099_v11 = vmul.f32 0.5, %v3090_v41 }
 0x95e   : > { %4235 = verf.f32 %v3105_v42 }
 0x95f   : > { %4237 = verf.f32 %v3107_v45 }
 0x965   : > { %v4224_v47 = vpop.eup %4223 }
 0x966   : > { %v4226_v28 = vpop.eup %4225  ;;  %v3116_v2 = vadd.f32 1.0, %v4224_v47 }
 0x967   : > { %v4228_v48 = vpop.eup %4227  ;;  %v3118_v8 = vadd.f32 1.0, %v4226_v28 }
 0x968   : > { %v4230_v49 = vpop.eup %4229  ;;  %v3117_v63 = vadd.f32 1.0, %v4228_v48  ;;  %v3124_v17 = vmul.f32 %v3116_v2, %v3092_v59  ;;  %v3844_v59 = vld [vmem:[%s711_s4] ss:$0 sm:$0xff] }
 0x969   : > { %v4232_v51 = vpop.eup %4231  ;;  %v3119_v3 = vadd.f32 1.0, %v4230_v49  ;;  %v3126_v20 = vmul.f32 %v3118_v8, %v3094_v14 }
 0x96a   : > { %v4234_v53 = vpop.eup %4233  ;;  %v3120_v0 = vadd.f32 1.0, %v4232_v51  ;;  %v3125_v16 = vmul.f32 %v3117_v63, %v3093_v61  ;;  %v3845_v63 = vld [vmem:[%s714_s11] ss:$0 sm:$0xff] }
 0x96b   : > { %v4236_v1 = vpop.eup %4235  ;;  %v3122_v5 = vadd.f32 1.0, %v4234_v53  ;;  %v3127_v19 = vmul.f32 %v3119_v3, %v3095_v58 }
 0x96c   : > { %v4238_v6 = vpop.eup %4237  ;;  %v3121_v50 = vadd.f32 1.0, %v4236_v1  ;;  %v3128_v46 = vmul.f32 %v3120_v0, %v3096_v4 }
 0x96d   : > { %v3123_v12 = vadd.f32 1.0, %v4238_v6  ;;  %v3130_v15 = vmul.f32 %v3122_v5, %v3098_v9 }
 0x96e   : > { %v3129_v52 = vmul.f32 %v3121_v50, %v3097_v10  ;;  %v3132_v23 = vpack.c.bf16 %v3128_v46, %v3124_v17 }
 0x96f   : > { %v3131_v55 = vmul.f32 %v3123_v12, %v3099_v11  ;;  %v3134_v24 = vpack.c.bf16 %v3130_v15, %v3126_v20 }
 0x970   : > { %v3133_v21 = vpack.c.bf16 %v3129_v52, %v3125_v16 }
 0x971   : > { %v3135_v60 = vpack.c.bf16 %v3131_v55, %v3127_v19 }
 0x972   : > { %3431 = vmatprep.mubr.bf16.mxu1 %v3133_v21 }
 0x973   : > { %3472 = vmatprep.mubr.bf16.mxu0 %v3135_v60  ;;  %3432 = vmatmul.mubr.bf16.vlgmr.msra.gmra.mxu1 %v3132_v23 }
 0x974   : > { %3473 = vmatmul.mubr.bf16.vlgmr.msra.gmra.mxu0 %v3134_v24 }
 0xa33   : > { %v3901_v22 = vpop.f32.mrf.mxu1 }
 0xa34   : > { %v3923_v7 = vpop.f32.mrf.mxu0 }
 0xa35   : > { %v3902_v26 = vpop.f32.mrf.mxu1 }
 0xa36   : > { %v3903_v27 = vadd.f32 %v3902_v26, %v3901_v22  ;;  %v3924_v29 = vpop.f32.mrf.mxu0 }
 0xa37   : > { %v3904_v30 = vpop.f32.mrf.mxu1  ;;  %v3925_v32 = vadd.f32 %v3924_v29, %v3923_v7 }
 0xa38   : > { %v3434_v31 = vadd.f32 %v3903_v27, %v3811_v25  ;;  %v3926_v33 = vpop.f32.mrf.mxu0 }
 0xa39   : > { %v3905_v34 = vpop.f32.mrf.mxu1 }
 0xa3a   : > { %v3475_v35 = vadd.f32 %v3925_v32, %v3434_v31  ;;  %v3906_v36 = vadd.f32 %v3905_v34, %v3904_v30  ;;  %v3927_v37 = vpop.f32.mrf.mxu0 }
 0xa3b   : > { %v3928_v13 = vadd.f32 %v3927_v37, %v3926_v33 }
 0xa3c   : > { %v3437_v56 = vadd.f32 %v3906_v36, %v3811_v25  ;;  %v3481_v62 = vadd.f32 %v3475_v35, %v5051_v43 }
 0xa3e   : > { %v3478_v38 = vadd.f32 %v3928_v13, %v3437_v56  ;;  %3485 = vadd.xlane.f32.xlu0 %v3481_v62 }
 0xa40   : > { %v3482_v18 = vadd.f32 %v3478_v38, %v5053_v44 }
 0xa42   : > { %3487 = vadd.xlane.f32.xlu1 %v3482_v18 }
 0xac7   : > { %v3486_v54 = vpop.xlane.xlu0 %3485 }
 0xac8   : > { %v3489_v57 = vmul.f32 0.0078125, %v3486_v54 }
 0xaca   : > { %v3491_v39 = vsub.f32 %v3481_v62, %v3489_v57 }
 0xacb   : > { %v3488_v40 = vpop.xlane.xlu1 %3487 }
 0xacc   : > { %v3490_v41 = vmul.f32 0.0078125, %v3488_v40  ;;  %v3493_v42 = vmul.f32 %v3491_v39, %v3491_v39 }
 0xace   : > { %v3492_v45 = vsub.f32 %v3482_v18, %v3490_v41  ;;  %3495 = vadd.xlane.f32.xlu0 %v3493_v42 }
 0xad0   : > { %v3494_v47 = vmul.f32 %v3492_v45, %v3492_v45 }
 0xad2   : > { %3497 = vadd.xlane.f32.xlu1 %v3494_v47 }
 0xb57   : > { %v3496_v28 = vpop.xlane.xlu0 %3495 }
 0xb58   : > { %v3499_v48 = vmul.f32 0.0078125, %v3496_v28 }
 0xb5a   : > { %v3501_v43 = vadd.f32 1e-12, %v3499_v48 }
 0xb5b   : > { %v3498_v49 = vpop.xlane.xlu1 %3497 }
 0xb5c   : > { %4239 = vrsqrt.f32 %v3501_v43  ;;  %v3500_v51 = vmul.f32 0.0078125, %v3498_v49 }
 0xb5e   : > { %v3502_v44 = vadd.f32 1e-12, %v3500_v51 }
 0xb60   : > { %4241 = vrsqrt.f32 %v3502_v44 }
 0xb69   : > { %v4240_v53 = vpop.eup %4239 }
 0xb6a   : > { %v3505_v61 = vmul.f32 %v4240_v53, %v3491_v39 }
 0xb6c   : > { %v3513_v0 = vmul.f32 %v3844_v59, %v3505_v61 }
 0xb6d   : > { %v4242_v1 = vpop.eup %4241 }
 0xb6e   : > { %v3521_v2 = vadd.f32 %v3845_v63, %v3513_v0  ;;  %v3506_v3 = vmul.f32 %v4242_v1, %v3492_v45 }
 0xb70   : > { %3523 = vst [vmem:[%s5191_s22] sm:$0xff] %v3521_v2  ;;  %v3514_v4 = vmul.f32 %v3844_v59, %v3506_v3 }
 0xb72   : > { %v3522_v5 = vadd.f32 %v3845_v63, %v3514_v4 }
 0xb74   : > { %3524 = vst [vmem:[%s5191_s22 + $0x8] sm:$0xff] %v3522_v5 }
 0xb75 PF: > { %s5196_s21 = sld [smem:[#allocation10_spill]]  ;;  %s5199_s18 = smov %s4359_s19 }
 0xb76   : > { %s5197_s4 = sld [smem:[#allocation9_spill]] }
 0xb77   : > { %s5198_s20 = sld [smem:[#allocation11_spill]] }
 0xb7b   : > { %p28_p5 = scmp.ge.s32.totalorder %s5196_s21, 4  }
 0xb7c   : > { %s5200_s19 = smov %s5197_s4 }
 0xb7d   :  { %30 = sbr.rel (!%p28_p5) target bundleno = 17 (0x11), region = 171 }
 0xb82   :  { %3536 = vsyncpa [#allocation3], 1 }
 0xb83   :  { %3538 = vsyncpa [#allocation3 + $0x1], 1 }
 0xb84   :  { %3539 = vsyncpa [#allocation5], 1 }
 0xb85   :  { %3541 = vsyncpa [#allocation5 + $0x1], 1 }

</bundles_post_ra>
